<compile_context>
chip_gen: v7x
topology: tpu7x:2x2x1
jax: 0.10.0
libtpu: 0.0.40
codegen_flags: <defaults>
</compile_context>

<pallas_src>
import functools

import jax
import jax.numpy as jnp
from jax.experimental import pallas as pl
from jax.experimental.pallas import tpu as pltpu


# ----------------------------- Pallas kernel -------------------------------- #

def _bilstm_chunk_kernel(gx_f_ref, gx_b_ref, whh_f_ref, whh_b_ref,   # inputs
                         y_f_ref, y_b_ref, hn_ref, cn_ref,           # outputs
                         h_f, c_f, h_b, c_b,                         # VMEM carry
                         *, hidden_size, chunk, unroll):
    H = hidden_size
    ci = pl.program_id(0)

    @pl.when(ci == 0)
    def _():
        h_f[...] = jnp.zeros_like(h_f)
        c_f[...] = jnp.zeros_like(c_f)
        h_b[...] = jnp.zeros_like(h_b)
        c_b[...] = jnp.zeros_like(c_b)

    w_f = whh_f_ref[...]     # (H, 4H), resident across all chunks
    w_b = whh_b_ref[...]     # (H, 4H)

    def cell(gates, c_prev):
        # PyTorch gate order [i, f, g, o]; slices are lane-aligned once H >= 128.
        i_g = jax.nn.sigmoid(gates[:, 0 * H:1 * H])
        f_g = jax.nn.sigmoid(gates[:, 1 * H:2 * H])
        g_g = jnp.tanh(gates[:, 2 * H:3 * H])
        o_g = jax.nn.sigmoid(gates[:, 3 * H:4 * H])
        c_new = f_g * c_prev + i_g * g_g
        h_new = o_g * jnp.tanh(c_new)
        return h_new, c_new

    def step(s, carry):
        hf, cf, hb, cb = carry
        # ---- forward direction: local time index s within this chunk ----
        g = gx_f_ref[s] + jnp.dot(hf, w_f, preferred_element_type=jnp.float32)
        hf, cf = cell(g, cf)
        y_f_ref[s] = hf

        # ---- backward direction: local index chunk-1-s of the reversed-order
        # chunk (see the rev index_map), i.e. global time runs T-1 .. 0 ----
        rs = chunk - 1 - s
        g = gx_b_ref[rs] + jnp.dot(hb, w_b, preferred_element_type=jnp.float32)
        hb, cb = cell(g, cb)
        y_b_ref[rs] = hb
        return (hf, cf, hb, cb)

    carry0 = (h_f[...], c_f[...], h_b[...], c_b[...])
    hf, cf, hb, cb = jax.lax.fori_loop(0, chunk, step, carry0, unroll=unroll)

    # Persist the recurrent state for the next chunk.
    h_f[...] = hf
    c_f[...] = cf
    h_b[...] = hb
    c_b[...] = cb

    @pl.when(ci == pl.num_programs(0) - 1)
    def _():
        hn_ref[0] = hf
        hn_ref[1] = hb
        cn_ref[0] = cf
        cn_ref[1] = cb


def _bilstm_layer(gx, whh_f, whh_b, hidden_size, chunk):
    """One bidirectional LSTM layer given pre-projected gates.

    gx: (T, B, 8H) time-major packed gates, forward gates in [..., :4H] and
        backward gates in [..., 4H:], both in ORIGINAL time order, already
        including x @ W_ih^T + b_ih + b_hh.
    whh_f, whh_b: (H, 4H) recurrent weights (transposed).
    Returns y_f (T,B,H), y_b (T,B,H) in original time order, h_n (2,B,H), c_n (2,B,H).
    """
    T, B, G2 = gx.shape
    H = hidden_size
    G = 4 * H
    assert G2 == 2 * G and T % chunk == 0
    nc = T // chunk

    if G % 128 == 0:
        # Address the packed array directly: block 0 / block 1 of the last dim.
        # No slice copies are materialized in HBM.
        in_arrays = (gx, gx)
        gx_f_spec = pl.BlockSpec((chunk, B, G), lambda c: (c, 0, 0))
        gx_b_spec = pl.BlockSpec((chunk, B, G), lambda c: (nc - 1 - c, 0, 1))
    else:
        # Fallback for lane-misaligned gate widths: materialize the two halves.
        in_arrays = (gx[..., :G], gx[..., G:])
        gx_f_spec = pl.BlockSpec((chunk, B, G), lambda c: (c, 0, 0))
        gx_b_spec = pl.BlockSpec((chunk, B, G), lambda c: (nc - 1 - c, 0, 0))

    def fwd_map(c):
        return (c, 0, 0)

    def rev_map(c):                      # backward dir: reversed chunk order
        return (nc - 1 - c, 0, 0)

    def const_map2(c):
        return (0, 0)

    def const_map3(c):
        return (0, 0, 0)

    unroll = True if chunk <= 16 else 8
    kernel = functools.partial(_bilstm_chunk_kernel, hidden_size=H, chunk=chunk,
                               unroll=unroll)
    return pl.pallas_call(
        kernel,
        out_shape=(
            jax.ShapeDtypeStruct((T, B, H), jnp.float32),   # y_f
            jax.ShapeDtypeStruct((T, B, H), jnp.float32),   # y_b
            jax.ShapeDtypeStruct((2, B, H), jnp.float32),   # h_n [fwd, bwd]
            jax.ShapeDtypeStruct((2, B, H), jnp.float32),   # c_n [fwd, bwd]
        ),
        grid_spec=pltpu.PrefetchScalarGridSpec(
            num_scalar_prefetch=0,
            grid=(nc,),
            in_specs=[
                gx_f_spec,                                  # forward gate chunks
                gx_b_spec,                                  # backward gate chunks (rev)
                pl.BlockSpec((H, G), const_map2),           # W_hh^T fwd (resident)
                pl.BlockSpec((H, G), const_map2),           # W_hh^T bwd (resident)
            ],
            out_specs=(
                pl.BlockSpec((chunk, B, H), fwd_map),
                pl.BlockSpec((chunk, B, H), rev_map),
                pl.BlockSpec((2, B, H), const_map3),
                pl.BlockSpec((2, B, H), const_map3),
            ),
            scratch_shapes=[
                pltpu.VMEM((B, H), jnp.float32),   # h fwd carry (across chunks)
                pltpu.VMEM((B, H), jnp.float32),   # c fwd carry
                pltpu.VMEM((B, H), jnp.float32),   # h bwd carry
                pltpu.VMEM((B, H), jnp.float32),   # c bwd carry
            ],
        ),
        compiler_params=pltpu.CompilerParams(
            dimension_semantics=("arbitrary",)),    # chunks are sequential (carry)
    )(*in_arrays, whh_f, whh_b)


# ------------------------------ Module wrapper ------------------------------ #

def init_lstm_params(key, num_layers, hidden_size, input_size):
    """Deterministic params, PyTorch nn.LSTM shapes (bidirectional)."""
    H = hidden_size
    bound = 1.0 / jnp.sqrt(jnp.float32(H))
    params = []
    for layer in range(num_layers):
        in_sz = input_size if layer == 0 else 2 * hidden_size
        layer_p = {}
        for d in ("f", "b"):
            key, k1, k2, k3, k4 = jax.random.split(key, 5)
            w_ih = jax.random.uniform(k1, (4 * H, in_sz), jnp.float32, -bound, bound)
            w_hh = jax.random.uniform(k2, (4 * H, H), jnp.float32, -bound, bound)
            b_ih = jax.random.uniform(k3, (4 * H,), jnp.float32, -bound, bound)
            b_hh = jax.random.uniform(k4, (4 * H,), jnp.float32, -bound, bound)
            layer_p[f"wih_{d}"] = w_ih.T                      # (in, 4H)
            layer_p[f"whh_{d}"] = w_hh.T                      # (H, 4H)
            layer_p[f"b_{d}"] = (b_ih + b_hh)[None, :]        # (1, 4H)
        params.append(layer_p)
    return params


def _pick_time_chunk(T, max_chunk=128):
    c = min(T, max_chunk)
    while T % c:
        c -= 1
    return c


def lstm_layer_forward(x, params, num_layers, hidden_size, lens=None,
                       max_time_chunk=128):
    """Equivalent of LSTMLayer.forward with lens=None: returns (output, (h_n, c_n)).

    x: (B, T, input_size)  [batch_first, like PyTorch]
    output: (B, T, 2*hidden_size)
    h_n, c_n: (2*num_layers, B, hidden_size), ordered [l0_fwd, l0_bwd, l1_fwd, ...]
    """
    # TODO(synk): lens path (pack_padded_sequence / pad_packed_sequence) not
    # implemented; padded timesteps are not masked out of the recurrence.
    del lens
    H = hidden_size
    x_t = jnp.transpose(x, (1, 0, 2)).astype(jnp.float32)   # (T, B, I) time-major
    T = x_t.shape[0]
    chunk = _pick_time_chunk(T, max_time_chunk)

    h_ns, c_ns = [], []
    y_f = y_b = None
    for l in range(num_layers):
        p = params[l]
        # Fold both directions' input projections into one weight (in, 8H).
        wih_cat = jnp.concatenate([p["wih_f"], p["wih_b"]], axis=1)   # (in, 8H)
        b_cat = jnp.concatenate([p["b_f"], p["b_b"]], axis=1)         # (1, 8H)
        if l == 0:
            # Hoisted, time-parallel input projection: one big matmul.
            gx = jnp.einsum('tbi,ig->tbg', x_t, wih_cat) + b_cat
        else:
            # Avoid materializing concat([y_f, y_b]): split W_ih into its halves;
            # each of y_f / y_b is streamed from HBM exactly once.
            gx = (jnp.einsum('tbh,hg->tbg', y_f, wih_cat[:H])
                  + jnp.einsum('tbh,hg->tbg', y_b, wih_cat[H:]) + b_cat)
        y_f, y_b, h_n, c_n = _bilstm_layer(gx, p["whh_f"], p["whh_b"], H, chunk)
        h_ns.append(h_n)
        c_ns.append(c_n)

    out = jnp.transpose(jnp.concatenate([y_f, y_b], axis=-1), (1, 0, 2))  # (B,T,2H)
    return out, (jnp.concatenate(h_ns, axis=0), jnp.concatenate(c_ns, axis=0))


# ------------------------ pure-JAX reference (check) ------------------------ #

def _ref_direction(x_tbi, w_ih_t, w_hh_t, bias, H):
    B = x_tbi.shape[1]
    def step(carry, x_t):
        h, c = carry
        g = x_t @ w_ih_t + h @ w_hh_t + bias
        i = jax.nn.sigmoid(g[:, 0*H:1*H]); f = jax.nn.sigmoid(g[:, 1*H:2*H])
        gg = jnp.tanh(g[:, 2*H:3*H]); o = jax.nn.sigmoid(g[:, 3*H:4*H])
        c = f * c + i * gg
        h = o * jnp.tanh(c)
        return (h, c), h
    init = (jnp.zeros((B, H), jnp.float32), jnp.zeros((B, H), jnp.float32))
    (h_n, c_n), ys = jax.lax.scan(step, init, x_tbi)
    return ys, h_n, c_n


def _ref_forward(x, params, num_layers, H):
    x_t = jnp.transpose(x, (1, 0, 2)).astype(jnp.float32)
    h_ns, c_ns = [], []
    for l in range(num_layers):
        p = params[l]
        y_f, h_f, c_f = _ref_direction(x_t, p["wih_f"], p["whh_f"], p["b_f"], H)
        y_b, h_b, c_b = _ref_direction(x_t[::-1], p["wih_b"], p["whh_b"], p["b_b"], H)
        y_b = y_b[::-1]
        x_t = jnp.concatenate([y_f, y_b], axis=-1)
        h_ns += [h_f, h_b]; c_ns += [c_f, c_b]
    return jnp.transpose(x_t, (1, 0, 2)), (jnp.stack(h_ns), jnp.stack(c_ns))


# ---------------------------------- main ------------------------------------ #

if __name__ == "__main__":
    num_layers = 2
    hidden_size = 32
    input_size = 16
    batch = 2
    seq = 8

    key = jax.random.PRNGKey(0)
    k_x, k_p = jax.random.split(key)
    x = jax.random.normal(k_x, (batch, seq, input_size), jnp.float32)
    params = init_lstm_params(k_p, num_layers, hidden_size, input_size)

    out, (h_n, c_n) = lstm_layer_forward(x, params, num_layers, hidden_size)
    jax.block_until_ready((out, h_n, c_n))

    # sanity-check against a pure-JAX lax.scan reference
    ref_out, (ref_h, ref_c) = _ref_forward(x, params, num_layers, hidden_size)
    assert out.shape == (batch, seq, 2 * hidden_size)
    assert h_n.shape == (2 * num_layers, batch, hidden_size)
    assert c_n.shape == (2 * num_layers, batch, hidden_size)
    assert jnp.allclose(out, ref_out, atol=1e-5, rtol=1e-5)
    assert jnp.allclose(h_n, ref_h, atol=1e-5, rtol=1e-5)
    assert jnp.allclose(c_n, ref_c, atol=1e-5, rtol=1e-5)

    print("KERNEL_OK")
</pallas_src>

<mosaic_0001>
module attributes {stable_mosaic.version = 11 : i64} {
  func.func @_bilstm_chunk_kernel(%arg0: i32, %arg1: memref<8x2x128xf32, #tpu.memory_space<vmem>>, %arg2: memref<8x2x128xf32, #tpu.memory_space<vmem>>, %arg3: memref<32x128xf32, #tpu.memory_space<vmem>>, %arg4: memref<32x128xf32, #tpu.memory_space<vmem>>, %arg5: memref<8x2x32xf32, #tpu.memory_space<vmem>>, %arg6: memref<8x2x32xf32, #tpu.memory_space<vmem>>, %arg7: memref<2x2x32xf32, #tpu.memory_space<vmem>>, %arg8: memref<2x2x32xf32, #tpu.memory_space<vmem>>, %arg9: memref<2x32xf32, #tpu.memory_space<vmem>>, %arg10: memref<2x32xf32, #tpu.memory_space<vmem>>, %arg11: memref<2x32xf32, #tpu.memory_space<vmem>>, %arg12: memref<2x32xf32, #tpu.memory_space<vmem>>) attributes {dimension_semantics = [#tpu.dimension_semantics<arbitrary>], iteration_bounds = array<i64: 1>, scalar_prefetch = 0 : i64, scratch_operands = 4 : i64, tpu.core_type = #tpu.core_type<tc>, window_params = [{transform_indices = @transform_0, window_bounds = array<i64: 8, 2, 128>}, {transform_indices = @transform_1, window_bounds = array<i64: 8, 2, 128>}, {pipeline_mode = #tpu.pipeline_mode<synchronous>, transform_indices = @transform_2, window_bounds = array<i64: 32, 128>}, {pipeline_mode = #tpu.pipeline_mode<synchronous>, transform_indices = @transform_3, window_bounds = array<i64: 32, 128>}, {transform_indices = @transform_4, window_bounds = array<i64: 8, 2, 32>}, {transform_indices = @transform_5, window_bounds = array<i64: 8, 2, 32>}, {pipeline_mode = #tpu.pipeline_mode<synchronous>, transform_indices = @transform_6, window_bounds = array<i64: 2, 2, 32>}, {pipeline_mode = #tpu.pipeline_mode<synchronous>, transform_indices = @transform_7, window_bounds = array<i64: 2, 2, 32>}]} {
    %c0_i32 = arith.constant 0 : i32
    %0 = arith.cmpi eq, %arg0, %c0_i32 : i32
    %1 = arith.extui %0 : i1 to i32
    %c0_i32_0 = arith.constant 0 : i32
    %2 = arith.cmpi ne, %1, %c0_i32_0 : i32
    scf.if %2 {
      %cst_158 = arith.constant 0.000000e+00 : f32
      %568 = vector.broadcast %cst_158 : f32 to vector<2x32xf32>
      %c0_159 = arith.constant 0 : index
      %c0_160 = arith.constant 0 : index
      %569 = vector.load %arg9[%c0_159, %c0_160] : memref<2x32xf32, #tpu.memory_space<vmem>>, vector<2x32xf32>
      tpu.vector_store %arg9[%c0_159, %c0_160], %568 {strides = array<i32>} : memref<2x32xf32, #tpu.memory_space<vmem>>, vector<2x32xf32>,
      %cst_161 = arith.constant 0.000000e+00 : f32
      %570 = vector.broadcast %cst_161 : f32 to vector<2x32xf32>
      %c0_162 = arith.constant 0 : index
      %c0_163 = arith.constant 0 : index
      %571 = vector.load %arg10[%c0_162, %c0_163] : memref<2x32xf32, #tpu.memory_space<vmem>>, vector<2x32xf32>
      tpu.vector_store %arg10[%c0_162, %c0_163], %570 {strides = array<i32>} : memref<2x32xf32, #tpu.memory_space<vmem>>, vector<2x32xf32>,
      %cst_164 = arith.constant 0.000000e+00 : f32
      %572 = vector.broadcast %cst_164 : f32 to vector<2x32xf32>
      %c0_165 = arith.constant 0 : index
      %c0_166 = arith.constant 0 : index
      %573 = vector.load %arg11[%c0_165, %c0_166] : memref<2x32xf32, #tpu.memory_space<vmem>>, vector<2x32xf32>
      tpu.vector_store %arg11[%c0_165, %c0_166], %572 {strides = array<i32>} : memref<2x32xf32, #tpu.memory_space<vmem>>, vector<2x32xf32>,
      %cst_167 = arith.constant 0.000000e+00 : f32
      %574 = vector.broadcast %cst_167 : f32 to vector<2x32xf32>
      %c0_168 = arith.constant 0 : index
      %c0_169 = arith.constant 0 : index
      %575 = vector.load %arg12[%c0_168, %c0_169] : memref<2x32xf32, #tpu.memory_space<vmem>>, vector<2x32xf32>
      tpu.vector_store %arg12[%c0_168, %c0_169], %574 {strides = array<i32>} : memref<2x32xf32, #tpu.memory_space<vmem>>, vector<2x32xf32>,
    } else {
    }
    %c0 = arith.constant 0 : index
    %c0_1 = arith.constant 0 : index
    %3 = vector.load %arg3[%c0, %c0_1] : memref<32x128xf32, #tpu.memory_space<vmem>>, vector<32x128xf32>
    %c0_2 = arith.constant 0 : index
    %c0_3 = arith.constant 0 : index
    %4 = vector.load %arg4[%c0_2, %c0_3] : memref<32x128xf32, #tpu.memory_space<vmem>>, vector<32x128xf32>
    %c0_4 = arith.constant 0 : index
    %c0_5 = arith.constant 0 : index
    %5 = vector.load %arg9[%c0_4, %c0_5] : memref<2x32xf32, #tpu.memory_space<vmem>>, vector<2x32xf32>
    %c0_6 = arith.constant 0 : index
    %c0_7 = arith.constant 0 : index
    %6 = vector.load %arg10[%c0_6, %c0_7] : memref<2x32xf32, #tpu.memory_space<vmem>>, vector<2x32xf32>
    %c0_8 = arith.constant 0 : index
    %c0_9 = arith.constant 0 : index
    %7 = vector.load %arg11[%c0_8, %c0_9] : memref<2x32xf32, #tpu.memory_space<vmem>>, vector<2x32xf32>
    %c0_10 = arith.constant 0 : index
    %c0_11 = arith.constant 0 : index
    %8 = vector.load %arg12[%c0_10, %c0_11] : memref<2x32xf32, #tpu.memory_space<vmem>>, vector<2x32xf32>
    %c0_i32_12 = arith.constant 0 : i32
    %9 = arith.index_cast %c0_i32_12 : i32 to index
    %c0_13 = arith.constant 0 : index
    %c0_14 = arith.constant 0 : index
    %10 = vector.load %arg1[%9, %c0_13, %c0_14] : memref<8x2x128xf32, #tpu.memory_space<vmem>>, vector<1x2x128xf32>
    %11 = vector.shape_cast %10 : vector<1x2x128xf32> to vector<2x128xf32>
    %cst = arith.constant dense<0.000000e+00> : vector<2x128xf32>
    %12 = tpu.matmul %5, %3, %cst {dimension_numbers = #tpu.dot_dimension_numbers<[1], [0], [0], [1], [0, 0, 1, 1], [], []>} : vector<2x32xf32>, vector<32x128xf32>, vector<2x128xf32> -> vector<2x128xf32>
    %13 = arith.addf %11, %12 : vector<2x128xf32>
    %14 = vector.extract_strided_slice %13 {offsets = [0, 0], sizes = [2, 32], strides = [1, 1]} : vector<2x128xf32> to vector<2x32xf32>
    %15 = arith.negf %14 : vector<2x32xf32>
    %16 = math.exp %15 : vector<2x32xf32>
    %cst_15 = arith.constant 1.000000e+00 : f32
    %17 = vector.broadcast %cst_15 : f32 to vector<2x32xf32>
    %18 = arith.addf %17, %16 : vector<2x32xf32>
    %19 = arith.divf %17, %18 : vector<2x32xf32>
    %20 = vector.extract_strided_slice %13 {offsets = [0, 32], sizes = [2, 32], strides = [1, 1]} : vector<2x128xf32> to vector<2x32xf32>
    %21 = arith.negf %20 : vector<2x32xf32>
    %22 = math.exp %21 : vector<2x32xf32>
    %cst_16 = arith.constant 1.000000e+00 : f32
    %23 = vector.broadcast %cst_16 : f32 to vector<2x32xf32>
    %24 = arith.addf %23, %22 : vector<2x32xf32>
    %25 = arith.divf %23, %24 : vector<2x32xf32>
    %26 = vector.extract_strided_slice %13 {offsets = [0, 64], sizes = [2, 32], strides = [1, 1]} : vector<2x128xf32> to vector<2x32xf32>
    %27 = math.tanh %26 : vector<2x32xf32>
    %28 = vector.extract_strided_slice %13 {offsets = [0, 96], sizes = [2, 32], strides = [1, 1]} : vector<2x128xf32> to vector<2x32xf32>
    %29 = arith.negf %28 : vector<2x32xf32>
    %30 = math.exp %29 : vector<2x32xf32>
    %cst_17 = arith.constant 1.000000e+00 : f32
    %31 = vector.broadcast %cst_17 : f32 to vector<2x32xf32>
    %32 = arith.addf %31, %30 : vector<2x32xf32>
    %33 = arith.divf %31, %32 : vector<2x32xf32>
    %34 = arith.mulf %25, %6 : vector<2x32xf32>
    %35 = arith.mulf %19, %27 : vector<2x32xf32>
    %36 = arith.addf %34, %35 : vector<2x32xf32>
    %37 = math.tanh %36 : vector<2x32xf32>
    %38 = arith.mulf %33, %37 : vector<2x32xf32>
    %39 = arith.index_cast %c0_i32_12 : i32 to index
    %c0_18 = arith.constant 0 : index
    %c0_19 = arith.constant 0 : index
    %40 = vector.load %arg5[%39, %c0_18, %c0_19] : memref<8x2x32xf32, #tpu.memory_space<vmem>>, vector<1x2x32xf32>
    %41 = vector.shape_cast %40 : vector<1x2x32xf32> to vector<2x32xf32>
    %42 = vector.shape_cast %38 : vector<2x32xf32> to vector<1x2x32xf32>
    tpu.vector_store %arg5[%39, %c0_18, %c0_19], %42 {strides = array<i32>} : memref<8x2x32xf32, #tpu.memory_space<vmem>>, vector<1x2x32xf32>,
    %c7_i32 = arith.constant 7 : i32
    %43 = arith.subi %c7_i32, %c0_i32_12 : i32
    %44 = arith.index_cast %43 : i32 to index
    %c0_20 = arith.constant 0 : index
    %c0_21 = arith.constant 0 : index
    %45 = vector.load %arg2[%44, %c0_20, %c0_21] : memref<8x2x128xf32, #tpu.memory_space<vmem>>, vector<1x2x128xf32>
    %46 = vector.shape_cast %45 : vector<1x2x128xf32> to vector<2x128xf32>
    %cst_22 = arith.constant dense<0.000000e+00> : vector<2x128xf32>
    %47 = tpu.matmul %7, %4, %cst_22 {dimension_numbers = #tpu.dot_dimension_numbers<[1], [0], [0], [1], [0, 0, 1, 1], [], []>} : vector<2x32xf32>, vector<32x128xf32>, vector<2x128xf32> -> vector<2x128xf32>
    %48 = arith.addf %46, %47 : vector<2x128xf32>
    %49 = vector.extract_strided_slice %48 {offsets = [0, 0], sizes = [2, 32], strides = [1, 1]} : vector<2x128xf32> to vector<2x32xf32>
    %50 = arith.negf %49 : vector<2x32xf32>
    %51 = math.exp %50 : vector<2x32xf32>
    %cst_23 = arith.constant 1.000000e+00 : f32
    %52 = vector.broadcast %cst_23 : f32 to vector<2x32xf32>
    %53 = arith.addf %52, %51 : vector<2x32xf32>
    %54 = arith.divf %52, %53 : vector<2x32xf32>
    %55 = vector.extract_strided_slice %48 {offsets = [0, 32], sizes = [2, 32], strides = [1, 1]} : vector<2x128xf32> to vector<2x32xf32>
    %56 = arith.negf %55 : vector<2x32xf32>
    %57 = math.exp %56 : vector<2x32xf32>
    %cst_24 = arith.constant 1.000000e+00 : f32
    %58 = vector.broadcast %cst_24 : f32 to vector<2x32xf32>
    %59 = arith.addf %58, %57 : vector<2x32xf32>
    %60 = arith.divf %58, %59 : vector<2x32xf32>
    %61 = vector.extract_strided_slice %48 {offsets = [0, 64], sizes = [2, 32], strides = [1, 1]} : vector<2x128xf32> to vector<2x32xf32>
    %62 = math.tanh %61 : vector<2x32xf32>
    %63 = vector.extract_strided_slice %48 {offsets = [0, 96], sizes = [2, 32], strides = [1, 1]} : vector<2x128xf32> to vector<2x32xf32>
    %64 = arith.negf %63 : vector<2x32xf32>
    %65 = math.exp %64 : vector<2x32xf32>
    %cst_25 = arith.constant 1.000000e+00 : f32
    %66 = vector.broadcast %cst_25 : f32 to vector<2x32xf32>
    %67 = arith.addf %66, %65 : vector<2x32xf32>
    %68 = arith.divf %66, %67 : vector<2x32xf32>
    %69 = arith.mulf %60, %8 : vector<2x32xf32>
    %70 = arith.mulf %54, %62 : vector<2x32xf32>
    %71 = arith.addf %69, %70 : vector<2x32xf32>
    %72 = math.tanh %71 : vector<2x32xf32>
    %73 = arith.mulf %68, %72 : vector<2x32xf32>
    %74 = arith.index_cast %43 : i32 to index
    %c0_26 = arith.constant 0 : index
    %c0_27 = arith.constant 0 : index
    %75 = vector.load %arg6[%74, %c0_26, %c0_27] : memref<8x2x32xf32, #tpu.memory_space<vmem>>, vector<1x2x32xf32>
    %76 = vector.shape_cast %75 : vector<1x2x32xf32> to vector<2x32xf32>
    %77 = vector.shape_cast %73 : vector<2x32xf32> to vector<1x2x32xf32>
    tpu.vector_store %arg6[%74, %c0_26, %c0_27], %77 {strides = array<i32>} : memref<8x2x32xf32, #tpu.memory_space<vmem>>, vector<1x2x32xf32>,
    %c1_i32 = arith.constant 1 : i32
    %78 = arith.index_cast %c1_i32 : i32 to index
    %c0_28 = arith.constant 0 : index
    %c0_29 = arith.constant 0 : index
    %79 = vector.load %arg1[%78, %c0_28, %c0_29] : memref<8x2x128xf32, #tpu.memory_space<vmem>>, vector<1x2x128xf32>
    %80 = vector.shape_cast %79 : vector<1x2x128xf32> to vector<2x128xf32>
    %cst_30 = arith.constant dense<0.000000e+00> : vector<2x128xf32>
    %81 = tpu.matmul %38, %3, %cst_30 {dimension_numbers = #tpu.dot_dimension_numbers<[1], [0], [0], [1], [0, 0, 1, 1], [], []>} : vector<2x32xf32>, vector<32x128xf32>, vector<2x128xf32> -> vector<2x128xf32>
    %82 = arith.addf %80, %81 : vector<2x128xf32>
    %83 = vector.extract_strided_slice %82 {offsets = [0, 0], sizes = [2, 32], strides = [1, 1]} : vector<2x128xf32> to vector<2x32xf32>
    %84 = arith.negf %83 : vector<2x32xf32>
    %85 = math.exp %84 : vector<2x32xf32>
    %cst_31 = arith.constant 1.000000e+00 : f32
    %86 = vector.broadcast %cst_31 : f32 to vector<2x32xf32>
    %87 = arith.addf %86, %85 : vector<2x32xf32>
    %88 = arith.divf %86, %87 : vector<2x32xf32>
    %89 = vector.extract_strided_slice %82 {offsets = [0, 32], sizes = [2, 32], strides = [1, 1]} : vector<2x128xf32> to vector<2x32xf32>
    %90 = arith.negf %89 : vector<2x32xf32>
    %91 = math.exp %90 : vector<2x32xf32>
    %cst_32 = arith.constant 1.000000e+00 : f32
    %92 = vector.broadcast %cst_32 : f32 to vector<2x32xf32>
    %93 = arith.addf %92, %91 : vector<2x32xf32>
    %94 = arith.divf %92, %93 : vector<2x32xf32>
    %95 = vector.extract_strided_slice %82 {offsets = [0, 64], sizes = [2, 32], strides = [1, 1]} : vector<2x128xf32> to vector<2x32xf32>
    %96 = math.tanh %95 : vector<2x32xf32>
    %97 = vector.extract_strided_slice %82 {offsets = [0, 96], sizes = [2, 32], strides = [1, 1]} : vector<2x128xf32> to vector<2x32xf32>
    %98 = arith.negf %97 : vector<2x32xf32>
    %99 = math.exp %98 : vector<2x32xf32>
    %cst_33 = arith.constant 1.000000e+00 : f32
    %100 = vector.broadcast %cst_33 : f32 to vector<2x32xf32>
    %101 = arith.addf %100, %99 : vector<2x32xf32>
    %102 = arith.divf %100, %101 : vector<2x32xf32>
    %103 = arith.mulf %94, %36 : vector<2x32xf32>
    %104 = arith.mulf %88, %96 : vector<2x32xf32>
    %105 = arith.addf %103, %104 : vector<2x32xf32>
    %106 = math.tanh %105 : vector<2x32xf32>
    %107 = arith.mulf %102, %106 : vector<2x32xf32>
    %108 = arith.index_cast %c1_i32 : i32 to index
    %c0_34 = arith.constant 0 : index
    %c0_35 = arith.constant 0 : index
    %109 = vector.load %arg5[%108, %c0_34, %c0_35] : memref<8x2x32xf32, #tpu.memory_space<vmem>>, vector<1x2x32xf32>
    %110 = vector.shape_cast %109 : vector<1x2x32xf32> to vector<2x32xf32>
    %111 = vector.shape_cast %107 : vector<2x32xf32> to vector<1x2x32xf32>
    tpu.vector_store %arg5[%108, %c0_34, %c0_35], %111 {strides = array<i32>} : memref<8x2x32xf32, #tpu.memory_space<vmem>>, vector<1x2x32xf32>,
    %c7_i32_36 = arith.constant 7 : i32
    %112 = arith.subi %c7_i32_36, %c1_i32 : i32
    %113 = arith.index_cast %112 : i32 to index
    %c0_37 = arith.constant 0 : index
    %c0_38 = arith.constant 0 : index
    %114 = vector.load %arg2[%113, %c0_37, %c0_38] : memref<8x2x128xf32, #tpu.memory_space<vmem>>, vector<1x2x128xf32>
    %115 = vector.shape_cast %114 : vector<1x2x128xf32> to vector<2x128xf32>
    %cst_39 = arith.constant dense<0.000000e+00> : vector<2x128xf32>
    %116 = tpu.matmul %73, %4, %cst_39 {dimension_numbers = #tpu.dot_dimension_numbers<[1], [0], [0], [1], [0, 0, 1, 1], [], []>} : vector<2x32xf32>, vector<32x128xf32>, vector<2x128xf32> -> vector<2x128xf32>
    %117 = arith.addf %115, %116 : vector<2x128xf32>
    %118 = vector.extract_strided_slice %117 {offsets = [0, 0], sizes = [2, 32], strides = [1, 1]} : vector<2x128xf32> to vector<2x32xf32>
    %119 = arith.negf %118 : vector<2x32xf32>
    %120 = math.exp %119 : vector<2x32xf32>
    %cst_40 = arith.constant 1.000000e+00 : f32
    %121 = vector.broadcast %cst_40 : f32 to vector<2x32xf32>
    %122 = arith.addf %121, %120 : vector<2x32xf32>
    %123 = arith.divf %121, %122 : vector<2x32xf32>
    %124 = vector.extract_strided_slice %117 {offsets = [0, 32], sizes = [2, 32], strides = [1, 1]} : vector<2x128xf32> to vector<2x32xf32>
    %125 = arith.negf %124 : vector<2x32xf32>
    %126 = math.exp %125 : vector<2x32xf32>
    %cst_41 = arith.constant 1.000000e+00 : f32
    %127 = vector.broadcast %cst_41 : f32 to vector<2x32xf32>
    %128 = arith.addf %127, %126 : vector<2x32xf32>
    %129 = arith.divf %127, %128 : vector<2x32xf32>
    %130 = vector.extract_strided_slice %117 {offsets = [0, 64], sizes = [2, 32], strides = [1, 1]} : vector<2x128xf32> to vector<2x32xf32>
    %131 = math.tanh %130 : vector<2x32xf32>
    %132 = vector.extract_strided_slice %117 {offsets = [0, 96], sizes = [2, 32], strides = [1, 1]} : vector<2x128xf32> to vector<2x32xf32>
    %133 = arith.negf %132 : vector<2x32xf32>
    %134 = math.exp %133 : vector<2x32xf32>
    %cst_42 = arith.constant 1.000000e+00 : f32
    %135 = vector.broadcast %cst_42 : f32 to vector<2x32xf32>
    %136 = arith.addf %135, %134 : vector<2x32xf32>
    %137 = arith.divf %135, %136 : vector<2x32xf32>
    %138 = arith.mulf %129, %71 : vector<2x32xf32>
    %139 = arith.mulf %123, %131 : vector<2x32xf32>
    %140 = arith.addf %138, %139 : vector<2x32xf32>
    %141 = math.tanh %140 : vector<2x32xf32>
    %142 = arith.mulf %137, %141 : vector<2x32xf32>
    %143 = arith.index_cast %112 : i32 to index
    %c0_43 = arith.constant 0 : index
    %c0_44 = arith.constant 0 : index
    %144 = vector.load %arg6[%143, %c0_43, %c0_44] : memref<8x2x32xf32, #tpu.memory_space<vmem>>, vector<1x2x32xf32>
    %145 = vector.shape_cast %144 : vector<1x2x32xf32> to vector<2x32xf32>
    %146 = vector.shape_cast %142 : vector<2x32xf32> to vector<1x2x32xf32>
    tpu.vector_store %arg6[%143, %c0_43, %c0_44], %146 {strides = array<i32>} : memref<8x2x32xf32, #tpu.memory_space<vmem>>, vector<1x2x32xf32>,
    %c2_i32 = arith.constant 2 : i32
    %147 = arith.index_cast %c2_i32 : i32 to index
    %c0_45 = arith.constant 0 : index
    %c0_46 = arith.constant 0 : index
    %148 = vector.load %arg1[%147, %c0_45, %c0_46] : memref<8x2x128xf32, #tpu.memory_space<vmem>>, vector<1x2x128xf32>
    %149 = vector.shape_cast %148 : vector<1x2x128xf32> to vector<2x128xf32>
    %cst_47 = arith.constant dense<0.000000e+00> : vector<2x128xf32>
    %150 = tpu.matmul %107, %3, %cst_47 {dimension_numbers = #tpu.dot_dimension_numbers<[1], [0], [0], [1], [0, 0, 1, 1], [], []>} : vector<2x32xf32>, vector<32x128xf32>, vector<2x128xf32> -> vector<2x128xf32>
    %151 = arith.addf %149, %150 : vector<2x128xf32>
    %152 = vector.extract_strided_slice %151 {offsets = [0, 0], sizes = [2, 32], strides = [1, 1]} : vector<2x128xf32> to vector<2x32xf32>
    %153 = arith.negf %152 : vector<2x32xf32>
    %154 = math.exp %153 : vector<2x32xf32>
    %cst_48 = arith.constant 1.000000e+00 : f32
    %155 = vector.broadcast %cst_48 : f32 to vector<2x32xf32>
    %156 = arith.addf %155, %154 : vector<2x32xf32>
    %157 = arith.divf %155, %156 : vector<2x32xf32>
    %158 = vector.extract_strided_slice %151 {offsets = [0, 32], sizes = [2, 32], strides = [1, 1]} : vector<2x128xf32> to vector<2x32xf32>
    %159 = arith.negf %158 : vector<2x32xf32>
    %160 = math.exp %159 : vector<2x32xf32>
    %cst_49 = arith.constant 1.000000e+00 : f32
    %161 = vector.broadcast %cst_49 : f32 to vector<2x32xf32>
    %162 = arith.addf %161, %160 : vector<2x32xf32>
    %163 = arith.divf %161, %162 : vector<2x32xf32>
    %164 = vector.extract_strided_slice %151 {offsets = [0, 64], sizes = [2, 32], strides = [1, 1]} : vector<2x128xf32> to vector<2x32xf32>
    %165 = math.tanh %164 : vector<2x32xf32>
    %166 = vector.extract_strided_slice %151 {offsets = [0, 96], sizes = [2, 32], strides = [1, 1]} : vector<2x128xf32> to vector<2x32xf32>
    %167 = arith.negf %166 : vector<2x32xf32>
    %168 = math.exp %167 : vector<2x32xf32>
    %cst_50 = arith.constant 1.000000e+00 : f32
    %169 = vector.broadcast %cst_50 : f32 to vector<2x32xf32>
    %170 = arith.addf %169, %168 : vector<2x32xf32>
    %171 = arith.divf %169, %170 : vector<2x32xf32>
    %172 = arith.mulf %163, %105 : vector<2x32xf32>
    %173 = arith.mulf %157, %165 : vector<2x32xf32>
    %174 = arith.addf %172, %173 : vector<2x32xf32>
    %175 = math.tanh %174 : vector<2x32xf32>
    %176 = arith.mulf %171, %175 : vector<2x32xf32>
    %177 = arith.index_cast %c2_i32 : i32 to index
    %c0_51 = arith.constant 0 : index
    %c0_52 = arith.constant 0 : index
    %178 = vector.load %arg5[%177, %c0_51, %c0_52] : memref<8x2x32xf32, #tpu.memory_space<vmem>>, vector<1x2x32xf32>
    %179 = vector.shape_cast %178 : vector<1x2x32xf32> to vector<2x32xf32>
    %180 = vector.shape_cast %176 : vector<2x32xf32> to vector<1x2x32xf32>
    tpu.vector_store %arg5[%177, %c0_51, %c0_52], %180 {strides = array<i32>} : memref<8x2x32xf32, #tpu.memory_space<vmem>>, vector<1x2x32xf32>,
    %c7_i32_53 = arith.constant 7 : i32
    %181 = arith.subi %c7_i32_53, %c2_i32 : i32
    %182 = arith.index_cast %181 : i32 to index
    %c0_54 = arith.constant 0 : index
    %c0_55 = arith.constant 0 : index
    %183 = vector.load %arg2[%182, %c0_54, %c0_55] : memref<8x2x128xf32, #tpu.memory_space<vmem>>, vector<1x2x128xf32>
    %184 = vector.shape_cast %183 : vector<1x2x128xf32> to vector<2x128xf32>
    %cst_56 = arith.constant dense<0.000000e+00> : vector<2x128xf32>
    %185 = tpu.matmul %142, %4, %cst_56 {dimension_numbers = #tpu.dot_dimension_numbers<[1], [0], [0], [1], [0, 0, 1, 1], [], []>} : vector<2x32xf32>, vector<32x128xf32>, vector<2x128xf32> -> vector<2x128xf32>
    %186 = arith.addf %184, %185 : vector<2x128xf32>
    %187 = vector.extract_strided_slice %186 {offsets = [0, 0], sizes = [2, 32], strides = [1, 1]} : vector<2x128xf32> to vector<2x32xf32>
    %188 = arith.negf %187 : vector<2x32xf32>
    %189 = math.exp %188 : vector<2x32xf32>
    %cst_57 = arith.constant 1.000000e+00 : f32
    %190 = vector.broadcast %cst_57 : f32 to vector<2x32xf32>
    %191 = arith.addf %190, %189 : vector<2x32xf32>
    %192 = arith.divf %190, %191 : vector<2x32xf32>
    %193 = vector.extract_strided_slice %186 {offsets = [0, 32], sizes = [2, 32], strides = [1, 1]} : vector<2x128xf32> to vector<2x32xf32>
    %194 = arith.negf %193 : vector<2x32xf32>
    %195 = math.exp %194 : vector<2x32xf32>
    %cst_58 = arith.constant 1.000000e+00 : f32
    %196 = vector.broadcast %cst_58 : f32 to vector<2x32xf32>
    %197 = arith.addf %196, %195 : vector<2x32xf32>
    %198 = arith.divf %196, %197 : vector<2x32xf32>
    %199 = vector.extract_strided_slice %186 {offsets = [0, 64], sizes = [2, 32], strides = [1, 1]} : vector<2x128xf32> to vector<2x32xf32>
    %200 = math.tanh %199 : vector<2x32xf32>
    %201 = vector.extract_strided_slice %186 {offsets = [0, 96], sizes = [2, 32], strides = [1, 1]} : vector<2x128xf32> to vector<2x32xf32>
    %202 = arith.negf %201 : vector<2x32xf32>
    %203 = math.exp %202 : vector<2x32xf32>
    %cst_59 = arith.constant 1.000000e+00 : f32
    %204 = vector.broadcast %cst_59 : f32 to vector<2x32xf32>
    %205 = arith.addf %204, %203 : vector<2x32xf32>
    %206 = arith.divf %204, %205 : vector<2x32xf32>
    %207 = arith.mulf %198, %140 : vector<2x32xf32>
    %208 = arith.mulf %192, %200 : vector<2x32xf32>
    %209 = arith.addf %207, %208 : vector<2x32xf32>
    %210 = math.tanh %209 : vector<2x32xf32>
    %211 = arith.mulf %206, %210 : vector<2x32xf32>
    %212 = arith.index_cast %181 : i32 to index
    %c0_60 = arith.constant 0 : index
    %c0_61 = arith.constant 0 : index
    %213 = vector.load %arg6[%212, %c0_60, %c0_61] : memref<8x2x32xf32, #tpu.memory_space<vmem>>, vector<1x2x32xf32>
    %214 = vector.shape_cast %213 : vector<1x2x32xf32> to vector<2x32xf32>
    %215 = vector.shape_cast %211 : vector<2x32xf32> to vector<1x2x32xf32>
    tpu.vector_store %arg6[%212, %c0_60, %c0_61], %215 {strides = array<i32>} : memref<8x2x32xf32, #tpu.memory_space<vmem>>, vector<1x2x32xf32>,
    %c3_i32 = arith.constant 3 : i32
    %216 = arith.index_cast %c3_i32 : i32 to index
    %c0_62 = arith.constant 0 : index
    %c0_63 = arith.constant 0 : index
    %217 = vector.load %arg1[%216, %c0_62, %c0_63] : memref<8x2x128xf32, #tpu.memory_space<vmem>>, vector<1x2x128xf32>
    %218 = vector.shape_cast %217 : vector<1x2x128xf32> to vector<2x128xf32>
    %cst_64 = arith.constant dense<0.000000e+00> : vector<2x128xf32>
    %219 = tpu.matmul %176, %3, %cst_64 {dimension_numbers = #tpu.dot_dimension_numbers<[1], [0], [0], [1], [0, 0, 1, 1], [], []>} : vector<2x32xf32>, vector<32x128xf32>, vector<2x128xf32> -> vector<2x128xf32>
    %220 = arith.addf %218, %219 : vector<2x128xf32>
    %221 = vector.extract_strided_slice %220 {offsets = [0, 0], sizes = [2, 32], strides = [1, 1]} : vector<2x128xf32> to vector<2x32xf32>
    %222 = arith.negf %221 : vector<2x32xf32>
    %223 = math.exp %222 : vector<2x32xf32>
    %cst_65 = arith.constant 1.000000e+00 : f32
    %224 = vector.broadcast %cst_65 : f32 to vector<2x32xf32>
    %225 = arith.addf %224, %223 : vector<2x32xf32>
    %226 = arith.divf %224, %225 : vector<2x32xf32>
    %227 = vector.extract_strided_slice %220 {offsets = [0, 32], sizes = [2, 32], strides = [1, 1]} : vector<2x128xf32> to vector<2x32xf32>
    %228 = arith.negf %227 : vector<2x32xf32>
    %229 = math.exp %228 : vector<2x32xf32>
    %cst_66 = arith.constant 1.000000e+00 : f32
    %230 = vector.broadcast %cst_66 : f32 to vector<2x32xf32>
    %231 = arith.addf %230, %229 : vector<2x32xf32>
    %232 = arith.divf %230, %231 : vector<2x32xf32>
    %233 = vector.extract_strided_slice %220 {offsets = [0, 64], sizes = [2, 32], strides = [1, 1]} : vector<2x128xf32> to vector<2x32xf32>
    %234 = math.tanh %233 : vector<2x32xf32>
    %235 = vector.extract_strided_slice %220 {offsets = [0, 96], sizes = [2, 32], strides = [1, 1]} : vector<2x128xf32> to vector<2x32xf32>
    %236 = arith.negf %235 : vector<2x32xf32>
    %237 = math.exp %236 : vector<2x32xf32>
    %cst_67 = arith.constant 1.000000e+00 : f32
    %238 = vector.broadcast %cst_67 : f32 to vector<2x32xf32>
    %239 = arith.addf %238, %237 : vector<2x32xf32>
    %240 = arith.divf %238, %239 : vector<2x32xf32>
    %241 = arith.mulf %232, %174 : vector<2x32xf32>
    %242 = arith.mulf %226, %234 : vector<2x32xf32>
    %243 = arith.addf %241, %242 : vector<2x32xf32>
    %244 = math.tanh %243 : vector<2x32xf32>
    %245 = arith.mulf %240, %244 : vector<2x32xf32>
    %246 = arith.index_cast %c3_i32 : i32 to index
    %c0_68 = arith.constant 0 : index
    %c0_69 = arith.constant 0 : index
    %247 = vector.load %arg5[%246, %c0_68, %c0_69] : memref<8x2x32xf32, #tpu.memory_space<vmem>>, vector<1x2x32xf32>
    %248 = vector.shape_cast %247 : vector<1x2x32xf32> to vector<2x32xf32>
    %249 = vector.shape_cast %245 : vector<2x32xf32> to vector<1x2x32xf32>
    tpu.vector_store %arg5[%246, %c0_68, %c0_69], %249 {strides = array<i32>} : memref<8x2x32xf32, #tpu.memory_space<vmem>>, vector<1x2x32xf32>,
    %c7_i32_70 = arith.constant 7 : i32
    %250 = arith.subi %c7_i32_70, %c3_i32 : i32
    %251 = arith.index_cast %250 : i32 to index
    %c0_71 = arith.constant 0 : index
    %c0_72 = arith.constant 0 : index
    %252 = vector.load %arg2[%251, %c0_71, %c0_72] : memref<8x2x128xf32, #tpu.memory_space<vmem>>, vector<1x2x128xf32>
    %253 = vector.shape_cast %252 : vector<1x2x128xf32> to vector<2x128xf32>
    %cst_73 = arith.constant dense<0.000000e+00> : vector<2x128xf32>
    %254 = tpu.matmul %211, %4, %cst_73 {dimension_numbers = #tpu.dot_dimension_numbers<[1], [0], [0], [1], [0, 0, 1, 1], [], []>} : vector<2x32xf32>, vector<32x128xf32>, vector<2x128xf32> -> vector<2x128xf32>
    %255 = arith.addf %253, %254 : vector<2x128xf32>
    %256 = vector.extract_strided_slice %255 {offsets = [0, 0], sizes = [2, 32], strides = [1, 1]} : vector<2x128xf32> to vector<2x32xf32>
    %257 = arith.negf %256 : vector<2x32xf32>
    %258 = math.exp %257 : vector<2x32xf32>
    %cst_74 = arith.constant 1.000000e+00 : f32
    %259 = vector.broadcast %cst_74 : f32 to vector<2x32xf32>
    %260 = arith.addf %259, %258 : vector<2x32xf32>
    %261 = arith.divf %259, %260 : vector<2x32xf32>
    %262 = vector.extract_strided_slice %255 {offsets = [0, 32], sizes = [2, 32], strides = [1, 1]} : vector<2x128xf32> to vector<2x32xf32>
    %263 = arith.negf %262 : vector<2x32xf32>
    %264 = math.exp %263 : vector<2x32xf32>
    %cst_75 = arith.constant 1.000000e+00 : f32
    %265 = vector.broadcast %cst_75 : f32 to vector<2x32xf32>
    %266 = arith.addf %265, %264 : vector<2x32xf32>
    %267 = arith.divf %265, %266 : vector<2x32xf32>
    %268 = vector.extract_strided_slice %255 {offsets = [0, 64], sizes = [2, 32], strides = [1, 1]} : vector<2x128xf32> to vector<2x32xf32>
    %269 = math.tanh %268 : vector<2x32xf32>
    %270 = vector.extract_strided_slice %255 {offsets = [0, 96], sizes = [2, 32], strides = [1, 1]} : vector<2x128xf32> to vector<2x32xf32>
    %271 = arith.negf %270 : vector<2x32xf32>
    %272 = math.exp %271 : vector<2x32xf32>
    %cst_76 = arith.constant 1.000000e+00 : f32
    %273 = vector.broadcast %cst_76 : f32 to vector<2x32xf32>
    %274 = arith.addf %273, %272 : vector<2x32xf32>
    %275 = arith.divf %273, %274 : vector<2x32xf32>
    %276 = arith.mulf %267, %209 : vector<2x32xf32>
    %277 = arith.mulf %261, %269 : vector<2x32xf32>
    %278 = arith.addf %276, %277 : vector<2x32xf32>
    %279 = math.tanh %278 : vector<2x32xf32>
    %280 = arith.mulf %275, %279 : vector<2x32xf32>
    %281 = arith.index_cast %250 : i32 to index
    %c0_77 = arith.constant 0 : index
    %c0_78 = arith.constant 0 : index
    %282 = vector.load %arg6[%281, %c0_77, %c0_78] : memref<8x2x32xf32, #tpu.memory_space<vmem>>, vector<1x2x32xf32>
    %283 = vector.shape_cast %282 : vector<1x2x32xf32> to vector<2x32xf32>
    %284 = vector.shape_cast %280 : vector<2x32xf32> to vector<1x2x32xf32>
    tpu.vector_store %arg6[%281, %c0_77, %c0_78], %284 {strides = array<i32>} : memref<8x2x32xf32, #tpu.memory_space<vmem>>, vector<1x2x32xf32>,
    %c4_i32 = arith.constant 4 : i32
    %285 = arith.index_cast %c4_i32 : i32 to index
    %c0_79 = arith.constant 0 : index
    %c0_80 = arith.constant 0 : index
    %286 = vector.load %arg1[%285, %c0_79, %c0_80] : memref<8x2x128xf32, #tpu.memory_space<vmem>>, vector<1x2x128xf32>
    %287 = vector.shape_cast %286 : vector<1x2x128xf32> to vector<2x128xf32>
    %cst_81 = arith.constant dense<0.000000e+00> : vector<2x128xf32>
    %288 = tpu.matmul %245, %3, %cst_81 {dimension_numbers = #tpu.dot_dimension_numbers<[1], [0], [0], [1], [0, 0, 1, 1], [], []>} : vector<2x32xf32>, vector<32x128xf32>, vector<2x128xf32> -> vector<2x128xf32>
    %289 = arith.addf %287, %288 : vector<2x128xf32>
    %290 = vector.extract_strided_slice %289 {offsets = [0, 0], sizes = [2, 32], strides = [1, 1]} : vector<2x128xf32> to vector<2x32xf32>
    %291 = arith.negf %290 : vector<2x32xf32>
    %292 = math.exp %291 : vector<2x32xf32>
    %cst_82 = arith.constant 1.000000e+00 : f32
    %293 = vector.broadcast %cst_82 : f32 to vector<2x32xf32>
    %294 = arith.addf %293, %292 : vector<2x32xf32>
    %295 = arith.divf %293, %294 : vector<2x32xf32>
    %296 = vector.extract_strided_slice %289 {offsets = [0, 32], sizes = [2, 32], strides = [1, 1]} : vector<2x128xf32> to vector<2x32xf32>
    %297 = arith.negf %296 : vector<2x32xf32>
    %298 = math.exp %297 : vector<2x32xf32>
    %cst_83 = arith.constant 1.000000e+00 : f32
    %299 = vector.broadcast %cst_83 : f32 to vector<2x32xf32>
    %300 = arith.addf %299, %298 : vector<2x32xf32>
    %301 = arith.divf %299, %300 : vector<2x32xf32>
    %302 = vector.extract_strided_slice %289 {offsets = [0, 64], sizes = [2, 32], strides = [1, 1]} : vector<2x128xf32> to vector<2x32xf32>
    %303 = math.tanh %302 : vector<2x32xf32>
    %304 = vector.extract_strided_slice %289 {offsets = [0, 96], sizes = [2, 32], strides = [1, 1]} : vector<2x128xf32> to vector<2x32xf32>
    %305 = arith.negf %304 : vector<2x32xf32>
    %306 = math.exp %305 : vector<2x32xf32>
    %cst_84 = arith.constant 1.000000e+00 : f32
    %307 = vector.broadcast %cst_84 : f32 to vector<2x32xf32>
    %308 = arith.addf %307, %306 : vector<2x32xf32>
    %309 = arith.divf %307, %308 : vector<2x32xf32>
    %310 = arith.mulf %301, %243 : vector<2x32xf32>
    %311 = arith.mulf %295, %303 : vector<2x32xf32>
    %312 = arith.addf %310, %311 : vector<2x32xf32>
    %313 = math.tanh %312 : vector<2x32xf32>
    %314 = arith.mulf %309, %313 : vector<2x32xf32>
    %315 = arith.index_cast %c4_i32 : i32 to index
    %c0_85 = arith.constant 0 : index
    %c0_86 = arith.constant 0 : index
    %316 = vector.load %arg5[%315, %c0_85, %c0_86] : memref<8x2x32xf32, #tpu.memory_space<vmem>>, vector<1x2x32xf32>
    %317 = vector.shape_cast %316 : vector<1x2x32xf32> to vector<2x32xf32>
    %318 = vector.shape_cast %314 : vector<2x32xf32> to vector<1x2x32xf32>
    tpu.vector_store %arg5[%315, %c0_85, %c0_86], %318 {strides = array<i32>} : memref<8x2x32xf32, #tpu.memory_space<vmem>>, vector<1x2x32xf32>,
    %c7_i32_87 = arith.constant 7 : i32
    %319 = arith.subi %c7_i32_87, %c4_i32 : i32
    %320 = arith.index_cast %319 : i32 to index
    %c0_88 = arith.constant 0 : index
    %c0_89 = arith.constant 0 : index
    %321 = vector.load %arg2[%320, %c0_88, %c0_89] : memref<8x2x128xf32, #tpu.memory_space<vmem>>, vector<1x2x128xf32>
    %322 = vector.shape_cast %321 : vector<1x2x128xf32> to vector<2x128xf32>
    %cst_90 = arith.constant dense<0.000000e+00> : vector<2x128xf32>
    %323 = tpu.matmul %280, %4, %cst_90 {dimension_numbers = #tpu.dot_dimension_numbers<[1], [0], [0], [1], [0, 0, 1, 1], [], []>} : vector<2x32xf32>, vector<32x128xf32>, vector<2x128xf32> -> vector<2x128xf32>
    %324 = arith.addf %322, %323 : vector<2x128xf32>
    %325 = vector.extract_strided_slice %324 {offsets = [0, 0], sizes = [2, 32], strides = [1, 1]} : vector<2x128xf32> to vector<2x32xf32>
    %326 = arith.negf %325 : vector<2x32xf32>
    %327 = math.exp %326 : vector<2x32xf32>
    %cst_91 = arith.constant 1.000000e+00 : f32
    %328 = vector.broadcast %cst_91 : f32 to vector<2x32xf32>
    %329 = arith.addf %328, %327 : vector<2x32xf32>
    %330 = arith.divf %328, %329 : vector<2x32xf32>
    %331 = vector.extract_strided_slice %324 {offsets = [0, 32], sizes = [2, 32], strides = [1, 1]} : vector<2x128xf32> to vector<2x32xf32>
    %332 = arith.negf %331 : vector<2x32xf32>
    %333 = math.exp %332 : vector<2x32xf32>
    %cst_92 = arith.constant 1.000000e+00 : f32
    %334 = vector.broadcast %cst_92 : f32 to vector<2x32xf32>
    %335 = arith.addf %334, %333 : vector<2x32xf32>
    %336 = arith.divf %334, %335 : vector<2x32xf32>
    %337 = vector.extract_strided_slice %324 {offsets = [0, 64], sizes = [2, 32], strides = [1, 1]} : vector<2x128xf32> to vector<2x32xf32>
    %338 = math.tanh %337 : vector<2x32xf32>
    %339 = vector.extract_strided_slice %324 {offsets = [0, 96], sizes = [2, 32], strides = [1, 1]} : vector<2x128xf32> to vector<2x32xf32>
    %340 = arith.negf %339 : vector<2x32xf32>
    %341 = math.exp %340 : vector<2x32xf32>
    %cst_93 = arith.constant 1.000000e+00 : f32
    %342 = vector.broadcast %cst_93 : f32 to vector<2x32xf32>
    %343 = arith.addf %342, %341 : vector<2x32xf32>
    %344 = arith.divf %342, %343 : vector<2x32xf32>
    %345 = arith.mulf %336, %278 : vector<2x32xf32>
    %346 = arith.mulf %330, %338 : vector<2x32xf32>
    %347 = arith.addf %345, %346 : vector<2x32xf32>
    %348 = math.tanh %347 : vector<2x32xf32>
    %349 = arith.mulf %344, %348 : vector<2x32xf32>
    %350 = arith.index_cast %319 : i32 to index
    %c0_94 = arith.constant 0 : index
    %c0_95 = arith.constant 0 : index
    %351 = vector.load %arg6[%350, %c0_94, %c0_95] : memref<8x2x32xf32, #tpu.memory_space<vmem>>, vector<1x2x32xf32>
    %352 = vector.shape_cast %351 : vector<1x2x32xf32> to vector<2x32xf32>
    %353 = vector.shape_cast %349 : vector<2x32xf32> to vector<1x2x32xf32>
    tpu.vector_store %arg6[%350, %c0_94, %c0_95], %353 {strides = array<i32>} : memref<8x2x32xf32, #tpu.memory_space<vmem>>, vector<1x2x32xf32>,
    %c5_i32 = arith.constant 5 : i32
    %354 = arith.index_cast %c5_i32 : i32 to index
    %c0_96 = arith.constant 0 : index
    %c0_97 = arith.constant 0 : index
    %355 = vector.load %arg1[%354, %c0_96, %c0_97] : memref<8x2x128xf32, #tpu.memory_space<vmem>>, vector<1x2x128xf32>
    %356 = vector.shape_cast %355 : vector<1x2x128xf32> to vector<2x128xf32>
    %cst_98 = arith.constant dense<0.000000e+00> : vector<2x128xf32>
    %357 = tpu.matmul %314, %3, %cst_98 {dimension_numbers = #tpu.dot_dimension_numbers<[1], [0], [0], [1], [0, 0, 1, 1], [], []>} : vector<2x32xf32>, vector<32x128xf32>, vector<2x128xf32> -> vector<2x128xf32>
    %358 = arith.addf %356, %357 : vector<2x128xf32>
    %359 = vector.extract_strided_slice %358 {offsets = [0, 0], sizes = [2, 32], strides = [1, 1]} : vector<2x128xf32> to vector<2x32xf32>
    %360 = arith.negf %359 : vector<2x32xf32>
    %361 = math.exp %360 : vector<2x32xf32>
    %cst_99 = arith.constant 1.000000e+00 : f32
    %362 = vector.broadcast %cst_99 : f32 to vector<2x32xf32>
    %363 = arith.addf %362, %361 : vector<2x32xf32>
    %364 = arith.divf %362, %363 : vector<2x32xf32>
    %365 = vector.extract_strided_slice %358 {offsets = [0, 32], sizes = [2, 32], strides = [1, 1]} : vector<2x128xf32> to vector<2x32xf32>
    %366 = arith.negf %365 : vector<2x32xf32>
    %367 = math.exp %366 : vector<2x32xf32>
    %cst_100 = arith.constant 1.000000e+00 : f32
    %368 = vector.broadcast %cst_100 : f32 to vector<2x32xf32>
    %369 = arith.addf %368, %367 : vector<2x32xf32>
    %370 = arith.divf %368, %369 : vector<2x32xf32>
    %371 = vector.extract_strided_slice %358 {offsets = [0, 64], sizes = [2, 32], strides = [1, 1]} : vector<2x128xf32> to vector<2x32xf32>
    %372 = math.tanh %371 : vector<2x32xf32>
    %373 = vector.extract_strided_slice %358 {offsets = [0, 96], sizes = [2, 32], strides = [1, 1]} : vector<2x128xf32> to vector<2x32xf32>
    %374 = arith.negf %373 : vector<2x32xf32>
    %375 = math.exp %374 : vector<2x32xf32>
    %cst_101 = arith.constant 1.000000e+00 : f32
    %376 = vector.broadcast %cst_101 : f32 to vector<2x32xf32>
    %377 = arith.addf %376, %375 : vector<2x32xf32>
    %378 = arith.divf %376, %377 : vector<2x32xf32>
    %379 = arith.mulf %370, %312 : vector<2x32xf32>
    %380 = arith.mulf %364, %372 : vector<2x32xf32>
    %381 = arith.addf %379, %380 : vector<2x32xf32>
    %382 = math.tanh %381 : vector<2x32xf32>
    %383 = arith.mulf %378, %382 : vector<2x32xf32>
    %384 = arith.index_cast %c5_i32 : i32 to index
    %c0_102 = arith.constant 0 : index
    %c0_103 = arith.constant 0 : index
    %385 = vector.load %arg5[%384, %c0_102, %c0_103] : memref<8x2x32xf32, #tpu.memory_space<vmem>>, vector<1x2x32xf32>
    %386 = vector.shape_cast %385 : vector<1x2x32xf32> to vector<2x32xf32>
    %387 = vector.shape_cast %383 : vector<2x32xf32> to vector<1x2x32xf32>
    tpu.vector_store %arg5[%384, %c0_102, %c0_103], %387 {strides = array<i32>} : memref<8x2x32xf32, #tpu.memory_space<vmem>>, vector<1x2x32xf32>,
    %c7_i32_104 = arith.constant 7 : i32
    %388 = arith.subi %c7_i32_104, %c5_i32 : i32
    %389 = arith.index_cast %388 : i32 to index
    %c0_105 = arith.constant 0 : index
    %c0_106 = arith.constant 0 : index
    %390 = vector.load %arg2[%389, %c0_105, %c0_106] : memref<8x2x128xf32, #tpu.memory_space<vmem>>, vector<1x2x128xf32>
    %391 = vector.shape_cast %390 : vector<1x2x128xf32> to vector<2x128xf32>
    %cst_107 = arith.constant dense<0.000000e+00> : vector<2x128xf32>
    %392 = tpu.matmul %349, %4, %cst_107 {dimension_numbers = #tpu.dot_dimension_numbers<[1], [0], [0], [1], [0, 0, 1, 1], [], []>} : vector<2x32xf32>, vector<32x128xf32>, vector<2x128xf32> -> vector<2x128xf32>
    %393 = arith.addf %391, %392 : vector<2x128xf32>
    %394 = vector.extract_strided_slice %393 {offsets = [0, 0], sizes = [2, 32], strides = [1, 1]} : vector<2x128xf32> to vector<2x32xf32>
    %395 = arith.negf %394 : vector<2x32xf32>
    %396 = math.exp %395 : vector<2x32xf32>
    %cst_108 = arith.constant 1.000000e+00 : f32
    %397 = vector.broadcast %cst_108 : f32 to vector<2x32xf32>
    %398 = arith.addf %397, %396 : vector<2x32xf32>
    %399 = arith.divf %397, %398 : vector<2x32xf32>
    %400 = vector.extract_strided_slice %393 {offsets = [0, 32], sizes = [2, 32], strides = [1, 1]} : vector<2x128xf32> to vector<2x32xf32>
    %401 = arith.negf %400 : vector<2x32xf32>
    %402 = math.exp %401 : vector<2x32xf32>
    %cst_109 = arith.constant 1.000000e+00 : f32
    %403 = vector.broadcast %cst_109 : f32 to vector<2x32xf32>
    %404 = arith.addf %403, %402 : vector<2x32xf32>
    %405 = arith.divf %403, %404 : vector<2x32xf32>
    %406 = vector.extract_strided_slice %393 {offsets = [0, 64], sizes = [2, 32], strides = [1, 1]} : vector<2x128xf32> to vector<2x32xf32>
    %407 = math.tanh %406 : vector<2x32xf32>
    %408 = vector.extract_strided_slice %393 {offsets = [0, 96], sizes = [2, 32], strides = [1, 1]} : vector<2x128xf32> to vector<2x32xf32>
    %409 = arith.negf %408 : vector<2x32xf32>
    %410 = math.exp %409 : vector<2x32xf32>
    %cst_110 = arith.constant 1.000000e+00 : f32
    %411 = vector.broadcast %cst_110 : f32 to vector<2x32xf32>
    %412 = arith.addf %411, %410 : vector<2x32xf32>
    %413 = arith.divf %411, %412 : vector<2x32xf32>
    %414 = arith.mulf %405, %347 : vector<2x32xf32>
    %415 = arith.mulf %399, %407 : vector<2x32xf32>
    %416 = arith.addf %414, %415 : vector<2x32xf32>
    %417 = math.tanh %416 : vector<2x32xf32>
    %418 = arith.mulf %413, %417 : vector<2x32xf32>
    %419 = arith.index_cast %388 : i32 to index
    %c0_111 = arith.constant 0 : index
    %c0_112 = arith.constant 0 : index
    %420 = vector.load %arg6[%419, %c0_111, %c0_112] : memref<8x2x32xf32, #tpu.memory_space<vmem>>, vector<1x2x32xf32>
    %421 = vector.shape_cast %420 : vector<1x2x32xf32> to vector<2x32xf32>
    %422 = vector.shape_cast %418 : vector<2x32xf32> to vector<1x2x32xf32>
    tpu.vector_store %arg6[%419, %c0_111, %c0_112], %422 {strides = array<i32>} : memref<8x2x32xf32, #tpu.memory_space<vmem>>, vector<1x2x32xf32>,
    %c6_i32 = arith.constant 6 : i32
    %423 = arith.index_cast %c6_i32 : i32 to index
    %c0_113 = arith.constant 0 : index
    %c0_114 = arith.constant 0 : index
    %424 = vector.load %arg1[%423, %c0_113, %c0_114] : memref<8x2x128xf32, #tpu.memory_space<vmem>>, vector<1x2x128xf32>
    %425 = vector.shape_cast %424 : vector<1x2x128xf32> to vector<2x128xf32>
    %cst_115 = arith.constant dense<0.000000e+00> : vector<2x128xf32>
    %426 = tpu.matmul %383, %3, %cst_115 {dimension_numbers = #tpu.dot_dimension_numbers<[1], [0], [0], [1], [0, 0, 1, 1], [], []>} : vector<2x32xf32>, vector<32x128xf32>, vector<2x128xf32> -> vector<2x128xf32>
    %427 = arith.addf %425, %426 : vector<2x128xf32>
    %428 = vector.extract_strided_slice %427 {offsets = [0, 0], sizes = [2, 32], strides = [1, 1]} : vector<2x128xf32> to vector<2x32xf32>
    %429 = arith.negf %428 : vector<2x32xf32>
    %430 = math.exp %429 : vector<2x32xf32>
    %cst_116 = arith.constant 1.000000e+00 : f32
    %431 = vector.broadcast %cst_116 : f32 to vector<2x32xf32>
    %432 = arith.addf %431, %430 : vector<2x32xf32>
    %433 = arith.divf %431, %432 : vector<2x32xf32>
    %434 = vector.extract_strided_slice %427 {offsets = [0, 32], sizes = [2, 32], strides = [1, 1]} : vector<2x128xf32> to vector<2x32xf32>
    %435 = arith.negf %434 : vector<2x32xf32>
    %436 = math.exp %435 : vector<2x32xf32>
    %cst_117 = arith.constant 1.000000e+00 : f32
    %437 = vector.broadcast %cst_117 : f32 to vector<2x32xf32>
    %438 = arith.addf %437, %436 : vector<2x32xf32>
    %439 = arith.divf %437, %438 : vector<2x32xf32>
    %440 = vector.extract_strided_slice %427 {offsets = [0, 64], sizes = [2, 32], strides = [1, 1]} : vector<2x128xf32> to vector<2x32xf32>
    %441 = math.tanh %440 : vector<2x32xf32>
    %442 = vector.extract_strided_slice %427 {offsets = [0, 96], sizes = [2, 32], strides = [1, 1]} : vector<2x128xf32> to vector<2x32xf32>
    %443 = arith.negf %442 : vector<2x32xf32>
    %444 = math.exp %443 : vector<2x32xf32>
    %cst_118 = arith.constant 1.000000e+00 : f32
    %445 = vector.broadcast %cst_118 : f32 to vector<2x32xf32>
    %446 = arith.addf %445, %444 : vector<2x32xf32>
    %447 = arith.divf %445, %446 : vector<2x32xf32>
    %448 = arith.mulf %439, %381 : vector<2x32xf32>
    %449 = arith.mulf %433, %441 : vector<2x32xf32>
    %450 = arith.addf %448, %449 : vector<2x32xf32>
    %451 = math.tanh %450 : vector<2x32xf32>
    %452 = arith.mulf %447, %451 : vector<2x32xf32>
    %453 = arith.index_cast %c6_i32 : i32 to index
    %c0_119 = arith.constant 0 : index
    %c0_120 = arith.constant 0 : index
    %454 = vector.load %arg5[%453, %c0_119, %c0_120] : memref<8x2x32xf32, #tpu.memory_space<vmem>>, vector<1x2x32xf32>
    %455 = vector.shape_cast %454 : vector<1x2x32xf32> to vector<2x32xf32>
    %456 = vector.shape_cast %452 : vector<2x32xf32> to vector<1x2x32xf32>
    tpu.vector_store %arg5[%453, %c0_119, %c0_120], %456 {strides = array<i32>} : memref<8x2x32xf32, #tpu.memory_space<vmem>>, vector<1x2x32xf32>,
    %c7_i32_121 = arith.constant 7 : i32
    %457 = arith.subi %c7_i32_121, %c6_i32 : i32
    %458 = arith.index_cast %457 : i32 to index
    %c0_122 = arith.constant 0 : index
    %c0_123 = arith.constant 0 : index
    %459 = vector.load %arg2[%458, %c0_122, %c0_123] : memref<8x2x128xf32, #tpu.memory_space<vmem>>, vector<1x2x128xf32>
    %460 = vector.shape_cast %459 : vector<1x2x128xf32> to vector<2x128xf32>
    %cst_124 = arith.constant dense<0.000000e+00> : vector<2x128xf32>
    %461 = tpu.matmul %418, %4, %cst_124 {dimension_numbers = #tpu.dot_dimension_numbers<[1], [0], [0], [1], [0, 0, 1, 1], [], []>} : vector<2x32xf32>, vector<32x128xf32>, vector<2x128xf32> -> vector<2x128xf32>
    %462 = arith.addf %460, %461 : vector<2x128xf32>
    %463 = vector.extract_strided_slice %462 {offsets = [0, 0], sizes = [2, 32], strides = [1, 1]} : vector<2x128xf32> to vector<2x32xf32>
    %464 = arith.negf %463 : vector<2x32xf32>
    %465 = math.exp %464 : vector<2x32xf32>
    %cst_125 = arith.constant 1.000000e+00 : f32
    %466 = vector.broadcast %cst_125 : f32 to vector<2x32xf32>
    %467 = arith.addf %466, %465 : vector<2x32xf32>
    %468 = arith.divf %466, %467 : vector<2x32xf32>
    %469 = vector.extract_strided_slice %462 {offsets = [0, 32], sizes = [2, 32], strides = [1, 1]} : vector<2x128xf32> to vector<2x32xf32>
    %470 = arith.negf %469 : vector<2x32xf32>
    %471 = math.exp %470 : vector<2x32xf32>
    %cst_126 = arith.constant 1.000000e+00 : f32
    %472 = vector.broadcast %cst_126 : f32 to vector<2x32xf32>
    %473 = arith.addf %472, %471 : vector<2x32xf32>
    %474 = arith.divf %472, %473 : vector<2x32xf32>
    %475 = vector.extract_strided_slice %462 {offsets = [0, 64], sizes = [2, 32], strides = [1, 1]} : vector<2x128xf32> to vector<2x32xf32>
    %476 = math.tanh %475 : vector<2x32xf32>
    %477 = vector.extract_strided_slice %462 {offsets = [0, 96], sizes = [2, 32], strides = [1, 1]} : vector<2x128xf32> to vector<2x32xf32>
    %478 = arith.negf %477 : vector<2x32xf32>
    %479 = math.exp %478 : vector<2x32xf32>
    %cst_127 = arith.constant 1.000000e+00 : f32
    %480 = vector.broadcast %cst_127 : f32 to vector<2x32xf32>
    %481 = arith.addf %480, %479 : vector<2x32xf32>
    %482 = arith.divf %480, %481 : vector<2x32xf32>
    %483 = arith.mulf %474, %416 : vector<2x32xf32>
    %484 = arith.mulf %468, %476 : vector<2x32xf32>
    %485 = arith.addf %483, %484 : vector<2x32xf32>
    %486 = math.tanh %485 : vector<2x32xf32>
    %487 = arith.mulf %482, %486 : vector<2x32xf32>
    %488 = arith.index_cast %457 : i32 to index
    %c0_128 = arith.constant 0 : index
    %c0_129 = arith.constant 0 : index
    %489 = vector.load %arg6[%488, %c0_128, %c0_129] : memref<8x2x32xf32, #tpu.memory_space<vmem>>, vector<1x2x32xf32>
    %490 = vector.shape_cast %489 : vector<1x2x32xf32> to vector<2x32xf32>
    %491 = vector.shape_cast %487 : vector<2x32xf32> to vector<1x2x32xf32>
    tpu.vector_store %arg6[%488, %c0_128, %c0_129], %491 {strides = array<i32>} : memref<8x2x32xf32, #tpu.memory_space<vmem>>, vector<1x2x32xf32>,
    %c7_i32_130 = arith.constant 7 : i32
    %492 = arith.index_cast %c7_i32_130 : i32 to index
    %c0_131 = arith.constant 0 : index
    %c0_132 = arith.constant 0 : index
    %493 = vector.load %arg1[%492, %c0_131, %c0_132] : memref<8x2x128xf32, #tpu.memory_space<vmem>>, vector<1x2x128xf32>
    %494 = vector.shape_cast %493 : vector<1x2x128xf32> to vector<2x128xf32>
    %cst_133 = arith.constant dense<0.000000e+00> : vector<2x128xf32>
    %495 = tpu.matmul %452, %3, %cst_133 {dimension_numbers = #tpu.dot_dimension_numbers<[1], [0], [0], [1], [0, 0, 1, 1], [], []>} : vector<2x32xf32>, vector<32x128xf32>, vector<2x128xf32> -> vector<2x128xf32>
    %496 = arith.addf %494, %495 : vector<2x128xf32>
    %497 = vector.extract_strided_slice %496 {offsets = [0, 0], sizes = [2, 32], strides = [1, 1]} : vector<2x128xf32> to vector<2x32xf32>
    %498 = arith.negf %497 : vector<2x32xf32>
    %499 = math.exp %498 : vector<2x32xf32>
    %cst_134 = arith.constant 1.000000e+00 : f32
    %500 = vector.broadcast %cst_134 : f32 to vector<2x32xf32>
    %501 = arith.addf %500, %499 : vector<2x32xf32>
    %502 = arith.divf %500, %501 : vector<2x32xf32>
    %503 = vector.extract_strided_slice %496 {offsets = [0, 32], sizes = [2, 32], strides = [1, 1]} : vector<2x128xf32> to vector<2x32xf32>
    %504 = arith.negf %503 : vector<2x32xf32>
    %505 = math.exp %504 : vector<2x32xf32>
    %cst_135 = arith.constant 1.000000e+00 : f32
    %506 = vector.broadcast %cst_135 : f32 to vector<2x32xf32>
    %507 = arith.addf %506, %505 : vector<2x32xf32>
    %508 = arith.divf %506, %507 : vector<2x32xf32>
    %509 = vector.extract_strided_slice %496 {offsets = [0, 64], sizes = [2, 32], strides = [1, 1]} : vector<2x128xf32> to vector<2x32xf32>
    %510 = math.tanh %509 : vector<2x32xf32>
    %511 = vector.extract_strided_slice %496 {offsets = [0, 96], sizes = [2, 32], strides = [1, 1]} : vector<2x128xf32> to vector<2x32xf32>
    %512 = arith.negf %511 : vector<2x32xf32>
    %513 = math.exp %512 : vector<2x32xf32>
    %cst_136 = arith.constant 1.000000e+00 : f32
    %514 = vector.broadcast %cst_136 : f32 to vector<2x32xf32>
    %515 = arith.addf %514, %513 : vector<2x32xf32>
    %516 = arith.divf %514, %515 : vector<2x32xf32>
    %517 = arith.mulf %508, %450 : vector<2x32xf32>
    %518 = arith.mulf %502, %510 : vector<2x32xf32>
    %519 = arith.addf %517, %518 : vector<2x32xf32>
    %520 = math.tanh %519 : vector<2x32xf32>
    %521 = arith.mulf %516, %520 : vector<2x32xf32>
    %522 = arith.index_cast %c7_i32_130 : i32 to index
    %c0_137 = arith.constant 0 : index
    %c0_138 = arith.constant 0 : index
    %523 = vector.load %arg5[%522, %c0_137, %c0_138] : memref<8x2x32xf32, #tpu.memory_space<vmem>>, vector<1x2x32xf32>
    %524 = vector.shape_cast %523 : vector<1x2x32xf32> to vector<2x32xf32>
    %525 = vector.shape_cast %521 : vector<2x32xf32> to vector<1x2x32xf32>
    tpu.vector_store %arg5[%522, %c0_137, %c0_138], %525 {strides = array<i32>} : memref<8x2x32xf32, #tpu.memory_space<vmem>>, vector<1x2x32xf32>,
    %c7_i32_139 = arith.constant 7 : i32
    %526 = arith.subi %c7_i32_139, %c7_i32_130 : i32
    %527 = arith.index_cast %526 : i32 to index
    %c0_140 = arith.constant 0 : index
    %c0_141 = arith.constant 0 : index
    %528 = vector.load %arg2[%527, %c0_140, %c0_141] : memref<8x2x128xf32, #tpu.memory_space<vmem>>, vector<1x2x128xf32>
    %529 = vector.shape_cast %528 : vector<1x2x128xf32> to vector<2x128xf32>
    %cst_142 = arith.constant dense<0.000000e+00> : vector<2x128xf32>
    %530 = tpu.matmul %487, %4, %cst_142 {dimension_numbers = #tpu.dot_dimension_numbers<[1], [0], [0], [1], [0, 0, 1, 1], [], []>} : vector<2x32xf32>, vector<32x128xf32>, vector<2x128xf32> -> vector<2x128xf32>
    %531 = arith.addf %529, %530 : vector<2x128xf32>
    %532 = vector.extract_strided_slice %531 {offsets = [0, 0], sizes = [2, 32], strides = [1, 1]} : vector<2x128xf32> to vector<2x32xf32>
    %533 = arith.negf %532 : vector<2x32xf32>
    %534 = math.exp %533 : vector<2x32xf32>
    %cst_143 = arith.constant 1.000000e+00 : f32
    %535 = vector.broadcast %cst_143 : f32 to vector<2x32xf32>
    %536 = arith.addf %535, %534 : vector<2x32xf32>
    %537 = arith.divf %535, %536 : vector<2x32xf32>
    %538 = vector.extract_strided_slice %531 {offsets = [0, 32], sizes = [2, 32], strides = [1, 1]} : vector<2x128xf32> to vector<2x32xf32>
    %539 = arith.negf %538 : vector<2x32xf32>
    %540 = math.exp %539 : vector<2x32xf32>
    %cst_144 = arith.constant 1.000000e+00 : f32
    %541 = vector.broadcast %cst_144 : f32 to vector<2x32xf32>
    %542 = arith.addf %541, %540 : vector<2x32xf32>
    %543 = arith.divf %541, %542 : vector<2x32xf32>
    %544 = vector.extract_strided_slice %531 {offsets = [0, 64], sizes = [2, 32], strides = [1, 1]} : vector<2x128xf32> to vector<2x32xf32>
    %545 = math.tanh %544 : vector<2x32xf32>
    %546 = vector.extract_strided_slice %531 {offsets = [0, 96], sizes = [2, 32], strides = [1, 1]} : vector<2x128xf32> to vector<2x32xf32>
    %547 = arith.negf %546 : vector<2x32xf32>
    %548 = math.exp %547 : vector<2x32xf32>
    %cst_145 = arith.constant 1.000000e+00 : f32
    %549 = vector.broadcast %cst_145 : f32 to vector<2x32xf32>
    %550 = arith.addf %549, %548 : vector<2x32xf32>
    %551 = arith.divf %549, %550 : vector<2x32xf32>
    %552 = arith.mulf %543, %485 : vector<2x32xf32>
    %553 = arith.mulf %537, %545 : vector<2x32xf32>
    %554 = arith.addf %552, %553 : vector<2x32xf32>
    %555 = math.tanh %554 : vector<2x32xf32>
    %556 = arith.mulf %551, %555 : vector<2x32xf32>
    %557 = arith.index_cast %526 : i32 to index
    %c0_146 = arith.constant 0 : index
    %c0_147 = arith.constant 0 : index
    %558 = vector.load %arg6[%557, %c0_146, %c0_147] : memref<8x2x32xf32, #tpu.memory_space<vmem>>, vector<1x2x32xf32>
    %559 = vector.shape_cast %558 : vector<1x2x32xf32> to vector<2x32xf32>
    %560 = vector.shape_cast %556 : vector<2x32xf32> to vector<1x2x32xf32>
    tpu.vector_store %arg6[%557, %c0_146, %c0_147], %560 {strides = array<i32>} : memref<8x2x32xf32, #tpu.memory_space<vmem>>, vector<1x2x32xf32>,
    %c8_i32 = arith.constant 8 : i32
    %c0_148 = arith.constant 0 : index
    %c0_149 = arith.constant 0 : index
    %561 = vector.load %arg9[%c0_148, %c0_149] : memref<2x32xf32, #tpu.memory_space<vmem>>, vector<2x32xf32>
    tpu.vector_store %arg9[%c0_148, %c0_149], %521 {strides = array<i32>} : memref<2x32xf32, #tpu.memory_space<vmem>>, vector<2x32xf32>,
    %c0_150 = arith.constant 0 : index
    %c0_151 = arith.constant 0 : index
    %562 = vector.load %arg10[%c0_150, %c0_151] : memref<2x32xf32, #tpu.memory_space<vmem>>, vector<2x32xf32>
    tpu.vector_store %arg10[%c0_150, %c0_151], %519 {strides = array<i32>} : memref<2x32xf32, #tpu.memory_space<vmem>>, vector<2x32xf32>,
    %c0_152 = arith.constant 0 : index
    %c0_153 = arith.constant 0 : index
    %563 = vector.load %arg11[%c0_152, %c0_153] : memref<2x32xf32, #tpu.memory_space<vmem>>, vector<2x32xf32>
    tpu.vector_store %arg11[%c0_152, %c0_153], %556 {strides = array<i32>} : memref<2x32xf32, #tpu.memory_space<vmem>>, vector<2x32xf32>,
    %c0_154 = arith.constant 0 : index
    %c0_155 = arith.constant 0 : index
    %564 = vector.load %arg12[%c0_154, %c0_155] : memref<2x32xf32, #tpu.memory_space<vmem>>, vector<2x32xf32>
    tpu.vector_store %arg12[%c0_154, %c0_155], %554 {strides = array<i32>} : memref<2x32xf32, #tpu.memory_space<vmem>>, vector<2x32xf32>,
    %c0_i32_156 = arith.constant 0 : i32
    %565 = arith.cmpi eq, %arg0, %c0_i32_156 : i32
    %566 = arith.extui %565 : i1 to i32
    %c0_i32_157 = arith.constant 0 : i32
    %567 = arith.cmpi ne, %566, %c0_i32_157 : i32
    scf.if %567 {
      %c0_158 = arith.constant 0 : index
      %c0_159 = arith.constant 0 : index
      %c0_160 = arith.constant 0 : index
      %568 = vector.load %arg7[%c0_158, %c0_159, %c0_160] : memref<2x2x32xf32, #tpu.memory_space<vmem>>, vector<1x2x32xf32>
      %569 = vector.shape_cast %568 : vector<1x2x32xf32> to vector<2x32xf32>
      %570 = vector.shape_cast %521 : vector<2x32xf32> to vector<1x2x32xf32>
      tpu.vector_store %arg7[%c0_158, %c0_159, %c0_160], %570 {strides = array<i32>} : memref<2x2x32xf32, #tpu.memory_space<vmem>>, vector<1x2x32xf32>,
      %c1 = arith.constant 1 : index
      %c0_161 = arith.constant 0 : index
      %c0_162 = arith.constant 0 : index
      %571 = vector.load %arg7[%c1, %c0_161, %c0_162] : memref<2x2x32xf32, #tpu.memory_space<vmem>>, vector<1x2x32xf32>
      %572 = vector.shape_cast %571 : vector<1x2x32xf32> to vector<2x32xf32>
      %573 = vector.shape_cast %556 : vector<2x32xf32> to vector<1x2x32xf32>
      tpu.vector_store %arg7[%c1, %c0_161, %c0_162], %573 {strides = array<i32>} : memref<2x2x32xf32, #tpu.memory_space<vmem>>, vector<1x2x32xf32>,
      %c0_163 = arith.constant 0 : index
      %c0_164 = arith.constant 0 : index
      %c0_165 = arith.constant 0 : index
      %574 = vector.load %arg8[%c0_163, %c0_164, %c0_165] : memref<2x2x32xf32, #tpu.memory_space<vmem>>, vector<1x2x32xf32>
      %575 = vector.shape_cast %574 : vector<1x2x32xf32> to vector<2x32xf32>
      %576 = vector.shape_cast %519 : vector<2x32xf32> to vector<1x2x32xf32>
      tpu.vector_store %arg8[%c0_163, %c0_164, %c0_165], %576 {strides = array<i32>} : memref<2x2x32xf32, #tpu.memory_space<vmem>>, vector<1x2x32xf32>,
      %c1_166 = arith.constant 1 : index
      %c0_167 = arith.constant 0 : index
      %c0_168 = arith.constant 0 : index
      %577 = vector.load %arg8[%c1_166, %c0_167, %c0_168] : memref<2x2x32xf32, #tpu.memory_space<vmem>>, vector<1x2x32xf32>
      %578 = vector.shape_cast %577 : vector<1x2x32xf32> to vector<2x32xf32>
      %579 = vector.shape_cast %554 : vector<2x32xf32> to vector<1x2x32xf32>
      tpu.vector_store %arg8[%c1_166, %c0_167, %c0_168], %579 {strides = array<i32>} : memref<2x2x32xf32, #tpu.memory_space<vmem>>, vector<1x2x32xf32>,
    } else {
    }
    return
  }
  func.func @transform_0(%arg0: i32) -> (i32, i32, i32) {
    %c0_i32 = arith.constant 0 : i32
    %c0_i32_0 = arith.constant 0 : i32
    %c0_i32_1 = arith.constant 0 : i32
    return %arg0, %c0_i32, %c0_i32_0 : i32, i32, i32
  }
  func.func @transform_1(%arg0: i32) -> (i32, i32, i32) {
    %c0_i32 = arith.constant 0 : i32
    %0 = arith.subi %c0_i32, %arg0 : i32
    %c0_i32_0 = arith.constant 0 : i32
    %c1_i32 = arith.constant 1 : i32
    %c0_i32_1 = arith.constant 0 : i32
    return %0, %c0_i32_0, %c1_i32 : i32, i32, i32
  }
  func.func @transform_2(%arg0: i32) -> (i32, i32) {
    %c0_i32 = arith.constant 0 : i32
    %c0_i32_0 = arith.constant 0 : i32
    %c0_i32_1 = arith.constant 0 : i32
    return %c0_i32, %c0_i32_0 : i32, i32
  }
  func.func @transform_3(%arg0: i32) -> (i32, i32) {
    %c0_i32 = arith.constant 0 : i32
    %c0_i32_0 = arith.constant 0 : i32
    %c0_i32_1 = arith.constant 0 : i32
    return %c0_i32, %c0_i32_0 : i32, i32
  }
  func.func @transform_4(%arg0: i32) -> (i32, i32, i32) {
    %c0_i32 = arith.constant 0 : i32
    %c0_i32_0 = arith.constant 0 : i32
    %c0_i32_1 = arith.constant 0 : i32
    return %arg0, %c0_i32, %c0_i32_0 : i32, i32, i32
  }
  func.func @transform_5(%arg0: i32) -> (i32, i32, i32) {
    %c0_i32 = arith.constant 0 : i32
    %0 = arith.subi %c0_i32, %arg0 : i32
    %c0_i32_0 = arith.constant 0 : i32
    %c0_i32_1 = arith.constant 0 : i32
    %c0_i32_2 = arith.constant 0 : i32
    return %0, %c0_i32_0, %c0_i32_1 : i32, i32, i32
  }
  func.func @transform_6(%arg0: i32) -> (i32, i32, i32) {
    %c0_i32 = arith.constant 0 : i32
    %c0_i32_0 = arith.constant 0 : i32
    %c0_i32_1 = arith.constant 0 : i32
    %c0_i32_2 = arith.constant 0 : i32
    return %c0_i32, %c0_i32_0, %c0_i32_1 : i32, i32, i32
  }
  func.func @transform_7(%arg0: i32) -> (i32, i32, i32) {
    %c0_i32 = arith.constant 0 : i32
    %c0_i32_0 = arith.constant 0 : i32
    %c0_i32_1 = arith.constant 0 : i32
    %c0_i32_2 = arith.constant 0 : i32
    return %c0_i32, %c0_i32_0, %c0_i32_1 : i32, i32, i32
  }
}

</mosaic_0001>

<bundles_post_ra>
// kernel: tpu_custom_call.1
= control target key start
LH: loop header
LB: loop body
LE: loop exit
PB: predicated region body
PF: predicated region fallthrough
CT: control target
= control target key end

     0   :  { %13 = vsyncpa [#allocation7], 0  ;;  %s3074_s0 = inlined_call_operand.hbm [shape: f32[8,2,256], index: 0, kind: input, shape index: {}]   ;;  %s3075_s1 = inlined_call_operand.hbm [shape: f32[8,2,256], index: 1, kind: input, shape index: {}]   ;;  %s3076_s2 = inlined_call_operand.hbm [shape: f32[32,128], index: 2, kind: input, shape index: {}]   ;;  %s3077_s3 = inlined_call_operand.hbm [shape: f32[32,128], index: 3, kind: input, shape index: {}]   ;;  %s3078_s4 = inlined_call_operand.hbm [shape: f32[8,2,32], index: 4, kind: output, shape index: {0}]   ;;  %s3079_s5 = inlined_call_operand.hbm [shape: f32[8,2,32], index: 5, kind: output, shape index: {1}]   ;;  %s3080_s6 = inlined_call_operand.hbm [shape: f32[2,2,32], index: 6, kind: output, shape index: {2}]   ;;  %s3081_s7 = inlined_call_operand.hbm [shape: f32[2,2,32], index: 7, kind: output, shape index: {3}]  }
   0x1   :  { %14 = vsyncpa [#allocation10], 0 }
   0x2   :  { %15 = vsyncpa [#allocation13], 0 }
   0x3   :  { %16 = vsyncpa [#allocation8], 0 }
   0x4   :  { %17 = vsyncpa [#allocation16], 0 }
   0x5   :  { %18 = vsyncpa [#allocation19], 0  ;;  %s2675_s26 = scalar_lea.hbm %s3075_s1, 32  ;;  %s2615_s27 = smov [#allocation9]  }
   0x6   :  { %s42_s28 = sshll.u32 %s2615_s27, 4  ;;  %s2616_s29 = smov [#allocation6]   ;;  %s43_s28 = int_to_ptr.vmem [resolvable:$true] %s42_s28 }
   0x7   :  { %s24_s30 = sshll.u32 %s2616_s29, 4  ;;  %s2448_s10 = scalar_lea.hbm %s3075_s1, 288  ;;  %s2677_s30 = int_to_ptr.vmem [resolvable:$true] %s24_s30 }
   0x8   :  { %p2425_p0 = scmp.ne.s32.totalorder %s2675_s26, %s2448_s10  ;;  %s2426_s13 = scalar_lea.hbm %s3075_s1, 512 }
   0x9   :  { %p2427_p1 = scmp.lt.u32.totalorder %s2675_s26, %s3075_s1  ;;  %p2428_p2 = scmp.lt.u32.totalorder %s2426_s13, %s2448_s10 }
   0xa   :  { %p2430_p4 = scmp.lt.u32.totalorder %s2448_s10, %s2675_s26 }
   0xb   :  { %p2429_p3 = por %p2428_p2, %p2427_p1 }
   0xd   :  { %p2431_p5 = por %p2430_p4, %p2429_p3 }
   0xf   :  { %p2432_p6 = pnand %p2431_p5, %p2425_p0 }
  0x11   :  { %2435 = shalt.err (!%p2432_p6)
}
  0x12   :  { %s2436_s16 = scalar_lea.vmem %s43_s28, 256  ;;  %p2441_p8 = scmp.lt.s32.totalorder %s43_s28, %s43_s28 }
  0x13   :  { %p2437_p7 = scmp.ne.s32.totalorder %s43_s28, %s2436_s16  ;;  %p2442_p9 = scmp.lt.s32.totalorder %s2436_s16, %s2436_s16 }
  0x15   :  { %p2443_p10 = por %p2442_p9, %p2441_p8 }
  0x17   :  { %p2444_p11 = pnand %p2443_p10, %p2437_p7 }
  0x19   :  { %2447 = shalt.err (!%p2444_p11)
}
  0x1a   :  { %s2617_s17 = smov 64   ;;  %s2618_s18 = smov 32  }
  0x1b   :  { %s2619_s19 = smov 2   ;;  %s2449_s21 = scalar_lea.hbm %s3074_s0, 256 }
  0x1c   :  { %48 = dma.hbm_to_vmem [thread:$0]  %s2675_s26, 256, %s43_s28, [#allocation10], %s2617_s17, %s2618_s18, %s2619_s19  }
  0x1d   :  { %p2450_p12 = scmp.ne.s32.totalorder %s3074_s0, %s2449_s21  ;;  %s2451_s27 = scalar_lea.hbm %s3074_s0, 512 }
  0x1e   :  { %p2452_p13 = scmp.lt.u32.totalorder %s2451_s27, %s2449_s21  ;;  %p2453_p0 = scmp.lt.u32.totalorder %s2449_s21, %s3074_s0 }
  0x20   :  { %p2454_p1 = por %p2453_p0, %p2452_p13 }
  0x22   :  { %p2455_p2 = pnand %p2454_p1, %p2450_p12 }
  0x24   :  { %2458 = shalt.err (!%p2455_p2)
}
  0x25   :  { %s2459_s26 = scalar_lea.vmem %s2677_s30, 256  ;;  %p2464_p4 = scmp.lt.s32.totalorder %s2677_s30, %s2677_s30 }
  0x26   :  { %p2460_p3 = scmp.ne.s32.totalorder %s2677_s30, %s2459_s26  ;;  %p2465_p5 = scmp.lt.s32.totalorder %s2459_s26, %s2459_s26 }
  0x28   :  { %p2466_p6 = por %p2465_p5, %p2464_p4 }
  0x2a   :  { %p2467_p7 = pnand %p2466_p6, %p2460_p3 }
  0x2c   :  { %2470 = shalt.err (!%p2467_p7)
}
  0x2d   :  { %30 = dma.hbm_to_vmem [thread:$0]  %s3074_s0, 256, %s2677_s30, [#allocation7], %s2617_s17, %s2618_s18, %s2619_s19  }
  0x2e   :  { %s2620_s10 = smov [#allocation11]   ;;  %s2471_s14 = scalar_lea.hbm %s3076_s2, 512 }
  0x2f   :  { %s54_s11 = sshll.u32 %s2620_s10, 4  ;;  %p2472_p8 = scmp.ne.s32.totalorder %s3076_s2, %s2471_s14  ;;  %s55_s11 = int_to_ptr.vmem [resolvable:$true] %s54_s11 }
  0x30   :  { %p2475_p9 = scmp.lt.u32.totalorder %s2471_s14, %s3076_s2 }
  0x32   :  { %p2477_p10 = pnand %p2475_p9, %p2472_p8 }
  0x34   :  { %2480 = shalt.err (!%p2477_p10)
}
  0x35   :  { %s2481_s21 = scalar_lea.vmem %s55_s11, 512  ;;  %p2486_p12 = scmp.lt.s32.totalorder %s55_s11, %s55_s11 }
  0x36   :  { %p2482_p11 = scmp.ne.s32.totalorder %s55_s11, %s2481_s21  ;;  %p2487_p13 = scmp.lt.s32.totalorder %s2481_s21, %s2481_s21 }
  0x38   :  { %p2488_p0 = por %p2487_p13, %p2486_p12 }
  0x3a   :  { %p2489_p1 = pnand %p2488_p0, %p2482_p11 }
  0x3c   :  { %2492 = shalt.err (!%p2489_p1)
}
  0x3d   :  { %s2621_s0 = smov 128   ;;  %s2622_s30 = smov 8  }
  0x3e   :  { %60 = dma.hbm_to_vmem [thread:$0]  %s3076_s2, 512, %s55_s11, [#allocation10], %s2621_s0, %s2621_s0, %s2622_s30  }
  0x3f   :  { %s2623_s24 = smov [#allocation12]   ;;  %s2493_s8 = scalar_lea.hbm %s3077_s3, 512 }
  0x40   :  { %s66_s25 = sshll.u32 %s2623_s24, 4  ;;  %p2494_p2 = scmp.ne.s32.totalorder %s3077_s3, %s2493_s8  ;;  %s67_s25 = int_to_ptr.vmem [resolvable:$true] %s66_s25 }
  0x41   :  { %p2497_p3 = scmp.lt.u32.totalorder %s2493_s8, %s3077_s3 }
  0x43   :  { %p2499_p4 = pnand %p2497_p3, %p2494_p2 }
  0x45   :  { %2502 = shalt.err (!%p2499_p4)
}
  0x46   :  { %s2503_s12 = scalar_lea.vmem %s67_s25, 512  ;;  %p2508_p6 = scmp.lt.s32.totalorder %s67_s25, %s67_s25 }
  0x47   :  { %p2504_p5 = scmp.ne.s32.totalorder %s67_s25, %s2503_s12  ;;  %p2509_p7 = scmp.lt.s32.totalorder %s2503_s12, %s2503_s12 }
  0x49   :  { %p2510_p8 = por %p2509_p7, %p2508_p6 }
  0x4b   :  { %p2511_p9 = pnand %p2510_p8, %p2504_p5 }
  0x4d   :  { %2514 = shalt.err (!%p2511_p9)
}
  0x4e   :  { %72 = dma.hbm_to_vmem [thread:$0]  %s3077_s3, 512, %s67_s25, [#allocation13], %s2621_s0, %s2621_s0, %s2622_s30  }
  0x4f   :  { %2603 = dma.done.wait [#allocation7], 256  }
  0x50   :  { %2604 = vsyncadd [#allocation7], 4294967040 }
  0x51   :  { %2605 = dma.done.wait [#allocation10], 768  }
  0x52   :  { %2606 = vsyncadd [#allocation10], 4294966528 }
  0x53   :  { %2607 = dma.done.wait [#allocation13], 512  }
  0x54   :  { %2608 = vsyncadd [#allocation13], 4294966784  ;;  %vm93_vm0 = vcmask 254976   ;;  %v2624_v0 = vmov 0.0|0.0   ;;  %v2625_v1 = vmov 0.0   ;;  %vm2626_vm1 = vmmov 0  }
  0x55   :  { %2189 = vmatprep.subr.bf16.mxu1 %v2624_v0  ;;  %2183 = vmatprep.subr.bf16.mxu0 %v2624_v0  ;;  %96 = vst.msk [vmem:[#allocation4] sm:$0x3] %vm93_vm0, %v2625_v1  ;;  %94 = vst.msk [vmem:[#allocation2] sm:$0x3] %vm93_vm0, %v2625_v1  ;;  %v102_v2 = vld [vmem:[#allocation12] sm:$0xff]  ;;  %v103_v3 = vld [vmem:[#allocation12 + $0x8] sm:$0xff] }
  0x56   :  { %95 = vst.msk [vmem:[#allocation3] sm:$0x3] %vm93_vm0, %v2625_v1  ;;  %97 = vst.msk [vmem:[#allocation5] sm:$0x3] %vm93_vm0, %v2625_v1  ;;  %2026 = vmatprep.mubr.msk.f32.mxu1 %vm2626_vm1, %v2625_v1  ;;  %2015 = vmatprep.mubr.msk.f32.mxu0 %vm2626_vm1, %v2625_v1  ;;  %v98_v4 = vld [vmem:[#allocation11] sm:$0xff]  ;;  %v2756_v5 = vpack.c.bf16 %v103_v3, %v102_v2  ;;  %v99_v6 = vld [vmem:[#allocation11 + $0x8] sm:$0xff] }
  0x57   :  { %v104_v7 = vld [vmem:[#allocation12 + $0x10] sm:$0xff]  ;;  %v105_v8 = vld [vmem:[#allocation12 + $0x18] sm:$0xff]  ;;  %v2758_v9 = vpack.c.bf16 %v99_v6, %v98_v4  ;;  %vm111_vm2 = vcmask 261120   ;;  %v110_v19 = vld [vmem:[#allocation6] sm:$0x3]  ;;  %s2627_s3 = smov 96  }
  0x58   :  { %v100_v10 = vld [vmem:[#allocation11 + $0x10] sm:$0xff]  ;;  %v101_v11 = vld [vmem:[#allocation11 + $0x18] sm:$0xff]  ;;  %2191 = vmatpush3.bf16.msra.mxu1 %v2756_v5  ;;  %v2761_v12 = vpack.c.bf16 %v105_v8, %v104_v7  ;;  %v331_v60 = vld [vmem:[#allocation6 + $0x2] sm:$0x3]  ;;  %s2628_s13 = smov [#allocation15]   ;;  %s2629_s15 = smov [#allocation14]  }
  0x59   :  { %2185 = vmatpush3.bf16.msra.mxu0 %v2758_v9  ;;  %2192 = vmatprep.subr.bf16.mxu1 %v2624_v0  ;;  %v2765_v14 = vpack.c.bf16 %v101_v11, %v100_v10  ;;  %v221_v18 = vld [vmem:[#allocation9 + $0xe] sm:$0x3]  ;;  %v436_v56 = vld [vmem:[#allocation9 + $0xc] sm:$0x3]  ;;  %s1840_s14 = sshll.u32 %s2628_s13, 4  ;;  %s1824_s16 = sshll.u32 %s2629_s15, 4  ;;  %s1841_s14 = int_to_ptr.vmem [resolvable:$true] %s1840_s14  ;;  %s1825_s16 = int_to_ptr.vmem [resolvable:$true] %s1824_s16 }
  0x5a   :  { %2186 = vmatprep.subr.bf16.mxu0 %v2624_v0  ;;  %s2631_s20 = smov [#allocation18]   ;;  %s2515_s0 = scalar_lea.vmem %s1841_s14, 256 }
  0x5b   :  { %s1864_s21 = sshll.u32 %s2631_s20, 4  ;;  %p2516_p10 = scmp.ne.s32.totalorder %s1841_s14, %s2515_s0  ;;  %s3015_s21 = int_to_ptr.vmem [resolvable:$true] %s1864_s21 }
  0x5c   :  { %2194 = vmatpush3.bf16.msra.mxu1 %v2761_v12  ;;  %v108_v16 = vld [vmem:[#allocation4] sm:$0x3]  ;;  %v106_v17 = vld [vmem:[#allocation2] sm:$0x3]  ;;  %p2520_p11 = scmp.lt.s32.totalorder %s1841_s14, %s1841_s14  ;;  %p2521_p12 = scmp.lt.s32.totalorder %s2515_s0, %s2515_s0 }
  0x5d   :  { %v109_v13 = vld [vmem:[#allocation5] sm:$0x3]  ;;  %v107_v15 = vld [vmem:[#allocation3] sm:$0x3]  ;;  %2188 = vmatpush3.bf16.msra.mxu0 %v2765_v14  ;;  %2201 = vmatprep.subr.bf16.mxu1 %v2624_v0 }
  0x5e   :  { %304 = vrot.lane.b32.xlu1 %v109_v13, %s2618_s18  ;;  %2195 = vmatprep.subr.bf16.mxu0 %v2624_v0  ;;  %p2522_p13 = por %p2521_p12, %p2520_p11 }
  0x5f   :  { %2027 = vmatmul.mubr.msk.f32.vlgmr.msra.gmra.mrb[0].mxu1 %vm111_vm2, %v108_v16 }
  0x60   :  { %2016 = vmatmul.mubr.msk.f32.vlgmr.msra.gmra.mrb[0].mxu0 %vm111_vm2, %v106_v17  ;;  %2203 = vmatpush3.bf16.msra.mxu1 %v2756_v5  ;;  %p2523_p0 = pnand %p2522_p13, %p2516_p10 }
  0x61   :  { %2204 = vmatprep.subr.bf16.mxu1 %v2624_v0  ;;  %2197 = vmatpush3.bf16.msra.mxu0 %v2758_v9 }
  0x62   :  { %194 = vrot.lane.b32.xlu1 %v107_v15, %s2618_s18  ;;  %2048 = vmatprep.mubr.msk.f32.mxu1 %vm2626_vm1, %v2625_v1 }
  0x63   :  { %2198 = vmatprep.subr.bf16.mxu0 %v2624_v0  ;;  %2037 = vmatprep.mubr.msk.f32.mxu0 %vm2626_vm1, %v2625_v1 }
  0x64   :  { %2206 = vmatpush3.bf16.msra.mxu1 %v2761_v12 }
  0x65   :  { %2200 = vmatpush3.bf16.msra.mxu0 %v2765_v14  ;;  %2213 = vmatprep.subr.bf16.mxu1 %v2624_v0 }
  0x66   :  { %2207 = vmatprep.subr.bf16.mxu0 %v2624_v0 }
  0xd0   :  { %v305_v40 = vpop.permute.xlu1 %304 }
  0xd4   :  { %v195_v42 = vpop.permute.xlu1 %194 }
 0x132   :  { %v291_v20 = vpop.f32.mrb[0].mxu1 }
 0x133   :  { %v295_v21 = vadd.f32 %v291_v20, %v221_v18  ;;  %v2028_v22 = vpop.f32.mrb[1].mxu1  ;;  %v181_v23 = vpop.f32.mrb[0].mxu0 }
 0x134   :  { %v185_v24 = vadd.f32 %v181_v23, %v110_v19  ;;  %v2017_v25 = vpop.f32.mrb[1].mxu0 }
 0x135   :  { %2296 = vtanh.f32 %v295_v21  ;;  %v1898_v28 = vmul.f32 -1.442695, %v295_v21 }
 0x136   :  { %2298 = vtanh.f32 %v185_v24  ;;  %v1896_v29 = vmul.f32 -1.442695, %v185_v24 }
 0x137   :  { %2300 = vpow2.f32 %v1898_v28 }
 0x138   :  { %2302 = vpow2.f32 %v1896_v29 }
 0x13f   :  { %v2297_v26 = vpop.eup %2296 }
 0x140   :  { %309 = vrot.lane.b32.xlu0 %v2297_v26, %s2617_s17  ;;  %v2299_v27 = vpop.eup %2298 }
 0x141   :  { %v2301_v30 = vpop.eup %2300 }
 0x142   :  { %v299_v31 = vadd.f32 1.0, %v2301_v30  ;;  %v2303_v32 = vpop.eup %2302 }
 0x143   :  { %v189_v33 = vadd.f32 1.0, %v2303_v32 }
 0x144   :  { %199 = vrot.lane.b32.xlu0 %v2299_v27, %s2617_s17  ;;  %2304 = vrcp.f32 %v299_v31 }
 0x145   :  { %2306 = vrcp.f32 %v189_v33 }
 0x14e   :  { %v2305_v34 = vpop.eup %2304 }
 0x14f   :  { %v2307_v37 = vpop.eup %2306  ;;  %v307_v41 = vmul.f32 %v2305_v34, %v305_v40 }
 0x150   :  { %v197_v45 = vmul.f32 %v2307_v37, %v195_v42 }
 0x1b2   :  { %v310_v35 = vpop.permute.xlu0 %309 }
 0x1b3   :  { %v312_v36 = vmul.f32 %v2305_v34, %v310_v35 }
 0x1b5   :  { %314 = vrot.lane.b32.xlu0 %v312_v36, %s2618_s18 }
 0x1b6   :  { %v200_v38 = vpop.permute.xlu0 %199 }
 0x1b7   :  { %v202_v39 = vmul.f32 %v2307_v37, %v200_v38  ;;  %v541_v38 = vld [vmem:[#allocation6 + $0x4] sm:$0x3] }
 0x1b9   :  { %204 = vrot.lane.b32.xlu1 %v202_v39, %s2618_s18 }
 0x227   :  { %v315_v43 = vpop.permute.xlu0 %314 }
 0x228   :  { %v2792_v44 = vadd.f32 %v315_v43, %v307_v41 }
 0x22a   :  { %2308 = vtanh.f32 %v2792_v44 }
 0x22b   :  { %v205_v46 = vpop.permute.xlu1 %204 }
 0x22c   :  { %v2795_v47 = vadd.f32 %v205_v46, %v197_v45 }
 0x22e   :  { %2310 = vtanh.f32 %v2795_v47 }
 0x234   :  { %v2309_v48 = vpop.eup %2308 }
 0x235   :  { %320 = vrot.lane.b32.xlu0 %v2309_v48, %s2617_s17 }
 0x238   :  { %v2311_v49 = vpop.eup %2310 }
 0x239   :  { %210 = vrot.lane.b32.xlu1 %v2311_v49, %s2617_s17 }
 0x2a7   :  { %v321_v50 = vpop.permute.xlu0 %320 }
 0x2a8   :  { %v323_v51 = vmul.f32 %v2305_v34, %v321_v50  ;;  %v646_v34 = vld [vmem:[#allocation9 + $0xa] sm:$0x3] }
 0x2aa   :  { %325 = vrot.lane.b32.xlu0 %v323_v51, %s2618_s18 }
 0x2ab   :  { %v211_v52 = vpop.permute.xlu1 %210 }
 0x2ac   :  { %v213_v53 = vmul.f32 %v2307_v37, %v211_v52 }
 0x2ae   :  { %215 = vrot.lane.b32.xlu1 %v213_v53, %s2618_s18 }
 0x31c   :  { %v326_v54 = vpop.permute.xlu0 %325 }
 0x31d   :  { %329 = vst.msk [vmem:[#allocation15 + $0xe] sm:$0x3] %vm93_vm0, %v326_v54  ;;  %2049 = vmatmul.mubr.msk.f32.vlgmr.msra.gmra.mrb[2].mxu1 %vm111_vm2, %v326_v54 }
 0x31e   :  { %2215 = vmatpush3.bf16.msra.mxu1 %v2756_v5  ;;  %2070 = vmatprep.mubr.msk.f32.mxu1 %vm2626_vm1, %v2625_v1 }
 0x31f   :  { %2216 = vmatprep.subr.bf16.mxu1 %v2624_v0 }
 0x320   :  { %v216_v55 = vpop.permute.xlu1 %215 }
 0x321   :  { %219 = vst.msk [vmem:[#allocation14] sm:$0x3] %vm93_vm0, %v216_v55  ;;  %2038 = vmatmul.mubr.msk.f32.vlgmr.msra.gmra.mrb[2].mxu0 %vm111_vm2, %v216_v55 }
 0x322   :  { %2209 = vmatpush3.bf16.msra.mxu0 %v2758_v9  ;;  %2218 = vmatpush3.bf16.msra.mxu1 %v2761_v12 }
 0x323   :  { %2210 = vmatprep.subr.bf16.mxu0 %v2624_v0  ;;  %2059 = vmatprep.mubr.msk.f32.mxu0 %vm2626_vm1, %v2625_v1 }
 0x324   :  { %2225 = vmatprep.subr.bf16.mxu1 %v2624_v0 }
 0x326   :  { %2212 = vmatpush3.bf16.msra.mxu0 %v2765_v14 }
 0x327   :  { %2219 = vmatprep.subr.bf16.mxu0 %v2624_v0 }
 0x3f0   :  { %v505_v57 = vpop.f32.mrb[2].mxu1 }
 0x3f1   :  { %v509_v58 = vadd.f32 %v505_v57, %v436_v56  ;;  %v2050_v59 = vpop.f32.mrb[3].mxu1 }
 0x3f3   :  { %2312 = vtanh.f32 %v509_v58  ;;  %v1902_v4 = vmul.f32 -1.442695, %v509_v58 }
 0x3f4   :  { %v400_v61 = vpop.f32.mrb[2].mxu0 }
 0x3f5   :  { %v404_v62 = vadd.f32 %v400_v61, %v331_v60  ;;  %v2039_v63 = vpop.f32.mrb[3].mxu0 }
 0x3f7   :  { %2314 = vtanh.f32 %v404_v62  ;;  %v1900_v6 = vmul.f32 -1.442695, %v404_v62 }
 0x3f8   :  { %2316 = vpow2.f32 %v1902_v4 }
 0x3f9   :  { %2318 = vpow2.f32 %v1900_v6 }
 0x3fd   :  { %v2313_v2 = vpop.eup %2312 }
 0x3fe   :  { %519 = vrot.lane.b32.xlu0 %v2313_v2, %s2617_s17 }
 0x401   :  { %v2315_v3 = vpop.eup %2314 }
 0x402   :  { %414 = vrot.lane.b32.xlu1 %v2315_v3, %s2617_s17  ;;  %v2317_v7 = vpop.eup %2316 }
 0x403   :  { %v513_v8 = vadd.f32 1.0, %v2317_v7  ;;  %v2319_v10 = vpop.eup %2318 }
 0x404   :  { %v408_v11 = vadd.f32 1.0, %v2319_v10  ;;  %v856_v10 = vld [vmem:[#allocation9 + $0x8] sm:$0x3] }
 0x405   :  { %2320 = vrcp.f32 %v513_v8 }
 0x406   :  { %2322 = vrcp.f32 %v408_v11 }
 0x40f   :  { %v2321_v13 = vpop.eup %2320 }
 0x410   :  { %v2323_v17 = vpop.eup %2322  ;;  %v517_v20 = vmul.f32 %v2321_v13, %v2792_v44 }
 0x411   :  { %v412_v23 = vmul.f32 %v2323_v17, %v2795_v47 }
 0x470   :  { %v520_v15 = vpop.permute.xlu0 %519 }
 0x471   :  { %v522_v16 = vmul.f32 %v2321_v13, %v520_v15 }
 0x473   :  { %524 = vrot.lane.b32.xlu0 %v522_v16, %s2618_s18  ;;  %v751_v16 = vld [vmem:[#allocation6 + $0x6] sm:$0x3] }
 0x474   :  { %v415_v18 = vpop.permute.xlu1 %414 }
 0x475   :  { %v417_v19 = vmul.f32 %v2323_v17, %v415_v18 }
 0x477   :  { %419 = vrot.lane.b32.xlu1 %v417_v19, %s2618_s18 }
 0x4e5   :  { %v525_v21 = vpop.permute.xlu0 %524 }
 0x4e6   :  { %v2823_v22 = vadd.f32 %v525_v21, %v517_v20 }
 0x4e8   :  { %2324 = vtanh.f32 %v2823_v22 }
 0x4e9   :  { %v420_v24 = vpop.permute.xlu1 %419 }
 0x4ea   :  { %v2827_v25 = vadd.f32 %v420_v24, %v412_v23 }
 0x4ec   :  { %2326 = vtanh.f32 %v2827_v25 }
 0x4f2   :  { %v2325_v26 = vpop.eup %2324 }
 0x4f3   :  { %530 = vrot.lane.b32.xlu0 %v2325_v26, %s2617_s17 }
 0x4f6   :  { %v2327_v27 = vpop.eup %2326 }
 0x4f7   :  { %425 = vrot.lane.b32.xlu1 %v2327_v27, %s2617_s17 }
 0x565   :  { %v531_v28 = vpop.permute.xlu0 %530 }
 0x566   :  { %v533_v29 = vmul.f32 %v2321_v13, %v531_v28 }
 0x568   :  { %535 = vrot.lane.b32.xlu0 %v533_v29, %s2618_s18 }
 0x569   :  { %v426_v30 = vpop.permute.xlu1 %425 }
 0x56a   :  { %v428_v31 = vmul.f32 %v2323_v17, %v426_v30 }
 0x56c   :  { %430 = vrot.lane.b32.xlu1 %v428_v31, %s2618_s18 }
 0x5da   :  { %v536_v32 = vpop.permute.xlu0 %535 }
 0x5db   :  { %539 = vst.msk [vmem:[#allocation15 + $0xc] sm:$0x3] %vm93_vm0, %v536_v32  ;;  %2071 = vmatmul.mubr.msk.f32.vlgmr.msra.gmra.mrb[4].mxu1 %vm111_vm2, %v536_v32 }
 0x5dc   :  { %2227 = vmatpush3.bf16.msra.mxu1 %v2756_v5  ;;  %2092 = vmatprep.mubr.msk.f32.mxu1 %vm2626_vm1, %v2625_v1 }
 0x5dd   :  { %2228 = vmatprep.subr.bf16.mxu1 %v2624_v0 }
 0x5de   :  { %v431_v33 = vpop.permute.xlu1 %430 }
 0x5df   :  { %434 = vst.msk [vmem:[#allocation14 + $0x2] sm:$0x3] %vm93_vm0, %v431_v33  ;;  %2060 = vmatmul.mubr.msk.f32.vlgmr.msra.gmra.mrb[4].mxu0 %vm111_vm2, %v431_v33 }
 0x5e0   :  { %2221 = vmatpush3.bf16.msra.mxu0 %v2758_v9  ;;  %2230 = vmatpush3.bf16.msra.mxu1 %v2761_v12 }
 0x5e1   :  { %2222 = vmatprep.subr.bf16.mxu0 %v2624_v0  ;;  %2081 = vmatprep.mubr.msk.f32.mxu0 %vm2626_vm1, %v2625_v1 }
 0x5e2   :  { %2237 = vmatprep.subr.bf16.mxu1 %v2624_v0 }
 0x5e4   :  { %2224 = vmatpush3.bf16.msra.mxu0 %v2765_v14 }
 0x5e5   :  { %2231 = vmatprep.subr.bf16.mxu0 %v2624_v0 }
 0x6ae   :  { %v715_v35 = vpop.f32.mrb[4].mxu1 }
 0x6af   :  { %v719_v36 = vadd.f32 %v715_v35, %v646_v34  ;;  %v2072_v37 = vpop.f32.mrb[5].mxu1 }
 0x6b1   :  { %2328 = vtanh.f32 %v719_v36  ;;  %v1906_v44 = vmul.f32 -1.442695, %v719_v36 }
 0x6b2   :  { %v610_v39 = vpop.f32.mrb[4].mxu0 }
 0x6b3   :  { %v614_v40 = vadd.f32 %v610_v39, %v541_v38  ;;  %v2061_v41 = vpop.f32.mrb[5].mxu0 }
 0x6b5   :  { %2330 = vtanh.f32 %v614_v40  ;;  %v1904_v45 = vmul.f32 -1.442695, %v614_v40 }
 0x6b6   :  { %2332 = vpow2.f32 %v1906_v44 }
 0x6b7   :  { %2334 = vpow2.f32 %v1904_v45 }
 0x6bb   :  { %v2329_v42 = vpop.eup %2328 }
 0x6bc   :  { %729 = vrot.lane.b32.xlu0 %v2329_v42, %s2617_s17 }
 0x6bf   :  { %v2331_v43 = vpop.eup %2330 }
 0x6c0   :  { %624 = vrot.lane.b32.xlu1 %v2331_v43, %s2617_s17  ;;  %v2333_v46 = vpop.eup %2332 }
 0x6c1   :  { %v723_v47 = vadd.f32 1.0, %v2333_v46  ;;  %v2335_v48 = vpop.eup %2334 }
 0x6c2   :  { %v618_v49 = vadd.f32 1.0, %v2335_v48  ;;  %v1066_v48 = vld [vmem:[#allocation9 + $0x6] sm:$0x3] }
 0x6c3   :  { %2336 = vrcp.f32 %v723_v47 }
 0x6c4   :  { %2338 = vrcp.f32 %v618_v49 }
 0x6cd   :  { %v2337_v50 = vpop.eup %2336 }
 0x6ce   :  { %v2339_v53 = vpop.eup %2338  ;;  %v727_v56 = vmul.f32 %v2337_v50, %v2823_v22 }
 0x6cf   :  { %v622_v59 = vmul.f32 %v2339_v53, %v2827_v25 }
 0x72e   :  { %v730_v51 = vpop.permute.xlu0 %729 }
 0x72f   :  { %v732_v52 = vmul.f32 %v2337_v50, %v730_v51 }
 0x731   :  { %734 = vrot.lane.b32.xlu0 %v732_v52, %s2618_s18  ;;  %v961_v52 = vld [vmem:[#allocation6 + $0x8] sm:$0x3] }
 0x732   :  { %v625_v54 = vpop.permute.xlu1 %624 }
 0x733   :  { %v627_v55 = vmul.f32 %v2339_v53, %v625_v54 }
 0x735   :  { %629 = vrot.lane.b32.xlu1 %v627_v55, %s2618_s18 }
 0x7a3   :  { %v735_v57 = vpop.permute.xlu0 %734 }
 0x7a4   :  { %v2855_v58 = vadd.f32 %v735_v57, %v727_v56 }
 0x7a6   :  { %2340 = vtanh.f32 %v2855_v58 }
 0x7a7   :  { %v630_v60 = vpop.permute.xlu1 %629 }
 0x7a8   :  { %v2859_v61 = vadd.f32 %v630_v60, %v622_v59 }
 0x7aa   :  { %2342 = vtanh.f32 %v2859_v61 }
 0x7b0   :  { %v2341_v62 = vpop.eup %2340 }
 0x7b1   :  { %740 = vrot.lane.b32.xlu0 %v2341_v62, %s2617_s17 }
 0x7b4   :  { %v2343_v63 = vpop.eup %2342 }
 0x7b5   :  { %635 = vrot.lane.b32.xlu1 %v2343_v63, %s2617_s17 }
 0x823   :  { %v741_v2 = vpop.permute.xlu0 %740 }
 0x824   :  { %v743_v3 = vmul.f32 %v2337_v50, %v741_v2 }
 0x826   :  { %745 = vrot.lane.b32.xlu0 %v743_v3, %s2618_s18 }
 0x827   :  { %v636_v4 = vpop.permute.xlu1 %635 }
 0x828   :  { %v638_v6 = vmul.f32 %v2339_v53, %v636_v4 }
 0x82a   :  { %640 = vrot.lane.b32.xlu1 %v638_v6, %s2618_s18 }
 0x898   :  { %v746_v7 = vpop.permute.xlu0 %745 }
 0x899   :  { %749 = vst.msk [vmem:[#allocation15 + $0xa] sm:$0x3] %vm93_vm0, %v746_v7  ;;  %2093 = vmatmul.mubr.msk.f32.vlgmr.msra.gmra.mrb[6].mxu1 %vm111_vm2, %v746_v7 }
 0x89a   :  { %2239 = vmatpush3.bf16.msra.mxu1 %v2756_v5  ;;  %2114 = vmatprep.mubr.msk.f32.mxu1 %vm2626_vm1, %v2625_v1 }
 0x89b   :  { %2240 = vmatprep.subr.bf16.mxu1 %v2624_v0 }
 0x89c   :  { %v641_v8 = vpop.permute.xlu1 %640 }
 0x89d   :  { %644 = vst.msk [vmem:[#allocation14 + $0x4] sm:$0x3] %vm93_vm0, %v641_v8  ;;  %2082 = vmatmul.mubr.msk.f32.vlgmr.msra.gmra.mrb[6].mxu0 %vm111_vm2, %v641_v8 }
 0x89e   :  { %2233 = vmatpush3.bf16.msra.mxu0 %v2758_v9  ;;  %2242 = vmatpush3.bf16.msra.mxu1 %v2761_v12 }
 0x89f   :  { %2234 = vmatprep.subr.bf16.mxu0 %v2624_v0  ;;  %2103 = vmatprep.mubr.msk.f32.mxu0 %vm2626_vm1, %v2625_v1 }
 0x8a0   :  { %2249 = vmatprep.subr.bf16.mxu1 %v2624_v0 }
 0x8a2   :  { %2236 = vmatpush3.bf16.msra.mxu0 %v2765_v14 }
 0x8a3   :  { %2243 = vmatprep.subr.bf16.mxu0 %v2624_v0 }
 0x96c   :  { %v925_v11 = vpop.f32.mrb[6].mxu1 }
 0x96d   :  { %v929_v13 = vadd.f32 %v925_v11, %v856_v10  ;;  %v2094_v15 = vpop.f32.mrb[7].mxu1 }
 0x96f   :  { %2344 = vtanh.f32 %v929_v13  ;;  %v1910_v22 = vmul.f32 -1.442695, %v929_v13 }
 0x970   :  { %v820_v17 = vpop.f32.mrb[6].mxu0 }
 0x971   :  { %v824_v18 = vadd.f32 %v820_v17, %v751_v16  ;;  %v2083_v19 = vpop.f32.mrb[7].mxu0 }
 0x973   :  { %2346 = vtanh.f32 %v824_v18  ;;  %v1908_v23 = vmul.f32 -1.442695, %v824_v18 }
 0x974   :  { %2348 = vpow2.f32 %v1910_v22 }
 0x975   :  { %2350 = vpow2.f32 %v1908_v23 }
 0x979   :  { %v2345_v20 = vpop.eup %2344 }
 0x97a   :  { %939 = vrot.lane.b32.xlu0 %v2345_v20, %s2617_s17 }
 0x97d   :  { %v2347_v21 = vpop.eup %2346 }
 0x97e   :  { %834 = vrot.lane.b32.xlu1 %v2347_v21, %s2617_s17  ;;  %v2349_v24 = vpop.eup %2348 }
 0x97f   :  { %v933_v25 = vadd.f32 1.0, %v2349_v24  ;;  %v2351_v26 = vpop.eup %2350 }
 0x980   :  { %v828_v27 = vadd.f32 1.0, %v2351_v26  ;;  %v1276_v26 = vld [vmem:[#allocation9 + $0x4] sm:$0x3] }
 0x981   :  { %2352 = vrcp.f32 %v933_v25 }
 0x982   :  { %2354 = vrcp.f32 %v828_v27 }
 0x98b   :  { %v2353_v28 = vpop.eup %2352 }
 0x98c   :  { %v2355_v31 = vpop.eup %2354  ;;  %v937_v34 = vmul.f32 %v2353_v28, %v2855_v58 }
 0x98d   :  { %v832_v37 = vmul.f32 %v2355_v31, %v2859_v61 }
 0x9ec   :  { %v940_v29 = vpop.permute.xlu0 %939 }
 0x9ed   :  { %v942_v30 = vmul.f32 %v2353_v28, %v940_v29 }
 0x9ef   :  { %944 = vrot.lane.b32.xlu0 %v942_v30, %s2618_s18  ;;  %v1171_v30 = vld [vmem:[#allocation6 + $0xa] sm:$0x3] }
 0x9f0   :  { %v835_v32 = vpop.permute.xlu1 %834 }
 0x9f1   :  { %v837_v33 = vmul.f32 %v2355_v31, %v835_v32 }
 0x9f3   :  { %839 = vrot.lane.b32.xlu1 %v837_v33, %s2618_s18 }
 0xa61   :  { %v945_v35 = vpop.permute.xlu0 %944 }
 0xa62   :  { %v2887_v36 = vadd.f32 %v945_v35, %v937_v34 }
 0xa64   :  { %2356 = vtanh.f32 %v2887_v36 }
 0xa65   :  { %v840_v38 = vpop.permute.xlu1 %839 }
 0xa66   :  { %v2891_v39 = vadd.f32 %v840_v38, %v832_v37 }
 0xa68   :  { %2358 = vtanh.f32 %v2891_v39 }
 0xa6e   :  { %v2357_v40 = vpop.eup %2356 }
 0xa6f   :  { %950 = vrot.lane.b32.xlu0 %v2357_v40, %s2617_s17 }
 0xa72   :  { %v2359_v41 = vpop.eup %2358 }
 0xa73   :  { %845 = vrot.lane.b32.xlu1 %v2359_v41, %s2617_s17 }
 0xae1   :  { %v951_v42 = vpop.permute.xlu0 %950 }
 0xae2   :  { %v953_v43 = vmul.f32 %v2353_v28, %v951_v42 }
 0xae4   :  { %955 = vrot.lane.b32.xlu0 %v953_v43, %s2618_s18 }
 0xae5   :  { %v846_v44 = vpop.permute.xlu1 %845 }
 0xae6   :  { %v848_v45 = vmul.f32 %v2355_v31, %v846_v44 }
 0xae8   :  { %850 = vrot.lane.b32.xlu1 %v848_v45, %s2618_s18 }
 0xb56   :  { %v956_v46 = vpop.permute.xlu0 %955 }
 0xb57   :  { %959 = vst.msk [vmem:[#allocation15 + $0x8] sm:$0x3] %vm93_vm0, %v956_v46  ;;  %2115 = vmatmul.mubr.msk.f32.vlgmr.msra.gmra.mrb[8].mxu1 %vm111_vm2, %v956_v46 }
 0xb58   :  { %2251 = vmatpush3.bf16.msra.mxu1 %v2756_v5  ;;  %2136 = vmatprep.mubr.msk.f32.mxu1 %vm2626_vm1, %v2625_v1 }
 0xb59   :  { %2252 = vmatprep.subr.bf16.mxu1 %v2624_v0 }
 0xb5a   :  { %v851_v47 = vpop.permute.xlu1 %850 }
 0xb5b   :  { %854 = vst.msk [vmem:[#allocation14 + $0x6] sm:$0x3] %vm93_vm0, %v851_v47  ;;  %2104 = vmatmul.mubr.msk.f32.vlgmr.msra.gmra.mrb[8].mxu0 %vm111_vm2, %v851_v47 }
 0xb5c   :  { %2245 = vmatpush3.bf16.msra.mxu0 %v2758_v9  ;;  %2254 = vmatpush3.bf16.msra.mxu1 %v2761_v12 }
 0xb5d   :  { %2246 = vmatprep.subr.bf16.mxu0 %v2624_v0  ;;  %2125 = vmatprep.mubr.msk.f32.mxu0 %vm2626_vm1, %v2625_v1 }
 0xb5e   :  { %2261 = vmatprep.subr.bf16.mxu1 %v2624_v0 }
 0xb60   :  { %2248 = vmatpush3.bf16.msra.mxu0 %v2765_v14 }
 0xb61   :  { %2255 = vmatprep.subr.bf16.mxu0 %v2624_v0 }
 0xc2a   :  { %v1135_v49 = vpop.f32.mrb[8].mxu1 }
 0xc2b   :  { %v1139_v50 = vadd.f32 %v1135_v49, %v1066_v48  ;;  %v2116_v51 = vpop.f32.mrb[9].mxu1 }
 0xc2d   :  { %2360 = vtanh.f32 %v1139_v50  ;;  %v1914_v58 = vmul.f32 -1.442695, %v1139_v50 }
 0xc2e   :  { %v1030_v53 = vpop.f32.mrb[8].mxu0 }
 0xc2f   :  { %v1034_v54 = vadd.f32 %v1030_v53, %v961_v52  ;;  %v2105_v55 = vpop.f32.mrb[9].mxu0 }
 0xc31   :  { %2362 = vtanh.f32 %v1034_v54  ;;  %v1912_v59 = vmul.f32 -1.442695, %v1034_v54 }
 0xc32   :  { %2364 = vpow2.f32 %v1914_v58 }
 0xc33   :  { %2366 = vpow2.f32 %v1912_v59 }
 0xc37   :  { %v2361_v56 = vpop.eup %2360 }
 0xc38   :  { %1149 = vrot.lane.b32.xlu0 %v2361_v56, %s2617_s17 }
 0xc3b   :  { %v2363_v57 = vpop.eup %2362 }
 0xc3c   :  { %1044 = vrot.lane.b32.xlu1 %v2363_v57, %s2617_s17  ;;  %v2365_v60 = vpop.eup %2364 }
 0xc3d   :  { %v1143_v61 = vadd.f32 1.0, %v2365_v60  ;;  %v2367_v62 = vpop.eup %2366 }
 0xc3e   :  { %v1038_v63 = vadd.f32 1.0, %v2367_v62 }
 0xc3f   :  { %2368 = vrcp.f32 %v1143_v61 }
 0xc40   :  { %2370 = vrcp.f32 %v1038_v63 }
 0xc49   :  { %v2369_v2 = vpop.eup %2368 }
 0xc4a   :  { %v2371_v6 = vpop.eup %2370  ;;  %v1147_v10 = vmul.f32 %v2369_v2, %v2887_v36 }
 0xc4b   :  { %v1042_v15 = vmul.f32 %v2371_v6, %v2891_v39 }
 0xcaa   :  { %v1150_v3 = vpop.permute.xlu0 %1149 }
 0xcab   :  { %v1152_v4 = vmul.f32 %v2369_v2, %v1150_v3  ;;  %v1381_v3 = vld [vmem:[#allocation6 + $0xc] sm:$0x3] }
 0xcad   :  { %1154 = vrot.lane.b32.xlu0 %v1152_v4, %s2618_s18 }
 0xcae   :  { %v1045_v7 = vpop.permute.xlu1 %1044 }
 0xcaf   :  { %v1047_v8 = vmul.f32 %v2371_v6, %v1045_v7 }
 0xcb1   :  { %1049 = vrot.lane.b32.xlu1 %v1047_v8, %s2618_s18 }
 0xd1f   :  { %v1155_v11 = vpop.permute.xlu0 %1154 }
 0xd20   :  { %v2919_v13 = vadd.f32 %v1155_v11, %v1147_v10 }
 0xd22   :  { %2372 = vtanh.f32 %v2919_v13 }
 0xd23   :  { %v1050_v16 = vpop.permute.xlu1 %1049 }
 0xd24   :  { %v2923_v17 = vadd.f32 %v1050_v16, %v1042_v15 }
 0xd26   :  { %2374 = vtanh.f32 %v2923_v17 }
 0xd2c   :  { %v2373_v18 = vpop.eup %2372 }
 0xd2d   :  { %1160 = vrot.lane.b32.xlu0 %v2373_v18, %s2617_s17 }
 0xd30   :  { %v2375_v19 = vpop.eup %2374 }
 0xd31   :  { %1055 = vrot.lane.b32.xlu1 %v2375_v19, %s2617_s17 }
 0xd9f   :  { %v1161_v20 = vpop.permute.xlu0 %1160 }
 0xda0   :  { %v1163_v21 = vmul.f32 %v2369_v2, %v1161_v20 }
 0xda2   :  { %1165 = vrot.lane.b32.xlu0 %v1163_v21, %s2618_s18 }
 0xda3   :  { %v1056_v22 = vpop.permute.xlu1 %1055 }
 0xda4   :  { %v1058_v23 = vmul.f32 %v2371_v6, %v1056_v22 }
 0xda6   :  { %1060 = vrot.lane.b32.xlu1 %v1058_v23, %s2618_s18 }
 0xe14   :  { %v1166_v24 = vpop.permute.xlu0 %1165 }
 0xe15   :  { %1169 = vst.msk [vmem:[#allocation15 + $0x6] sm:$0x3] %vm93_vm0, %v1166_v24  ;;  %2137 = vmatmul.mubr.msk.f32.vlgmr.msra.gmra.mrb[10].mxu1 %vm111_vm2, %v1166_v24 }
 0xe16   :  { %2263 = vmatpush3.bf16.msra.mxu1 %v2756_v5  ;;  %2158 = vmatprep.mubr.msk.f32.mxu1 %vm2626_vm1, %v2625_v1 }
 0xe17   :  { %2264 = vmatprep.subr.bf16.mxu1 %v2624_v0 }
 0xe18   :  { %v1061_v25 = vpop.permute.xlu1 %1060 }
 0xe19   :  { %1064 = vst.msk [vmem:[#allocation14 + $0x8] sm:$0x3] %vm93_vm0, %v1061_v25  ;;  %2126 = vmatmul.mubr.msk.f32.vlgmr.msra.gmra.mrb[10].mxu0 %vm111_vm2, %v1061_v25 }
 0xe1a   :  { %2257 = vmatpush3.bf16.msra.mxu0 %v2758_v9  ;;  %2266 = vmatpush3.bf16.msra.mxu1 %v2761_v12 }
 0xe1b   :  { %2258 = vmatprep.subr.bf16.mxu0 %v2624_v0  ;;  %2147 = vmatprep.mubr.msk.f32.mxu0 %vm2626_vm1, %v2625_v1 }
 0xe1c   :  { %2273 = vmatprep.subr.bf16.mxu1 %v2624_v0 }
 0xe1e   :  { %2260 = vmatpush3.bf16.msra.mxu0 %v2765_v14 }
 0xe1f   :  { %2267 = vmatprep.subr.bf16.mxu0 %v2624_v0 }
 0xee8   :  { %v1345_v27 = vpop.f32.mrb[10].mxu1 }
 0xee9   :  { %v1349_v28 = vadd.f32 %v1345_v27, %v1276_v26  ;;  %v2138_v29 = vpop.f32.mrb[11].mxu1 }
 0xeeb   :  { %2376 = vtanh.f32 %v1349_v28  ;;  %v1918_v36 = vmul.f32 -1.442695, %v1349_v28 }
 0xeec   :  { %v1240_v31 = vpop.f32.mrb[10].mxu0 }
 0xeed   :  { %v1244_v32 = vadd.f32 %v1240_v31, %v1171_v30  ;;  %v2127_v33 = vpop.f32.mrb[11].mxu0 }
 0xeef   :  { %2378 = vtanh.f32 %v1244_v32  ;;  %v1916_v37 = vmul.f32 -1.442695, %v1244_v32 }
 0xef0   :  { %2380 = vpow2.f32 %v1918_v36 }
 0xef1   :  { %2382 = vpow2.f32 %v1916_v37 }
 0xef5   :  { %v2377_v34 = vpop.eup %2376 }
 0xef6   :  { %1359 = vrot.lane.b32.xlu0 %v2377_v34, %s2617_s17  ;;  %v1695_v34 = vld [vmem:[#allocation9] sm:$0x3] }
 0xef9   :  { %v2379_v35 = vpop.eup %2378 }
 0xefa   :  { %1254 = vrot.lane.b32.xlu1 %v2379_v35, %s2617_s17  ;;  %v2381_v38 = vpop.eup %2380 }
 0xefb   :  { %v1353_v39 = vadd.f32 1.0, %v2381_v38  ;;  %v2383_v40 = vpop.eup %2382  ;;  %v1591_v38 = vld [vmem:[#allocation6 + $0xe] sm:$0x3] }
 0xefc   :  { %v1248_v41 = vadd.f32 1.0, %v2383_v40 }
 0xefd   :  { %2384 = vrcp.f32 %v1353_v39 }
 0xefe   :  { %2386 = vrcp.f32 %v1248_v41 }
 0xf07   :  { %v2385_v42 = vpop.eup %2384 }
 0xf08   :  { %v2387_v45 = vpop.eup %2386  ;;  %v1357_v48 = vmul.f32 %v2385_v42, %v2919_v13 }
 0xf09   :  { %v1252_v51 = vmul.f32 %v2387_v45, %v2923_v17 }
 0xf68   :  { %v1360_v43 = vpop.permute.xlu0 %1359 }
 0xf69   :  { %v1362_v44 = vmul.f32 %v2385_v42, %v1360_v43 }
 0xf6b   :  { %1364 = vrot.lane.b32.xlu0 %v1362_v44, %s2618_s18 }
 0xf6c   :  { %v1255_v46 = vpop.permute.xlu1 %1254 }
 0xf6d   :  { %v1257_v47 = vmul.f32 %v2387_v45, %v1255_v46 }
 0xf6f   :  { %1259 = vrot.lane.b32.xlu1 %v1257_v47, %s2618_s18 }
 0xfdd   :  { %v1365_v49 = vpop.permute.xlu0 %1364 }
 0xfde   :  { %v1367_v50 = vadd.f32 %v1365_v49, %v1357_v48 }
 0xfe0   :  { %2388 = vtanh.f32 %v1367_v50 }
 0xfe1   :  { %v1260_v52 = vpop.permute.xlu1 %1259 }
 0xfe2   :  { %v1262_v53 = vadd.f32 %v1260_v52, %v1252_v51 }
 0xfe4   :  { %2390 = vtanh.f32 %v1262_v53 }
 0xfea   :  { %v2389_v54 = vpop.eup %2388 }
 0xfeb   :  { %1370 = vrot.lane.b32.xlu0 %v2389_v54, %s2617_s17 }
 0xfee   :  { %v2391_v55 = vpop.eup %2390 }
 0xfef   :  { %1265 = vrot.lane.b32.xlu1 %v2391_v55, %s2617_s17 }
0x105d   :  { %v1371_v56 = vpop.permute.xlu0 %1370 }
0x105e   :  { %v1373_v57 = vmul.f32 %v2385_v42, %v1371_v56 }
0x1060   :  { %1375 = vrot.lane.b32.xlu0 %v1373_v57, %s2618_s18 }
0x1061   :  { %v1266_v58 = vpop.permute.xlu1 %1265 }
0x1062   :  { %v1268_v59 = vmul.f32 %v2387_v45, %v1266_v58 }
0x1064   :  { %1270 = vrot.lane.b32.xlu1 %v1268_v59, %s2618_s18 }
0x10d2   :  { %v1376_v60 = vpop.permute.xlu0 %1375 }
0x10d3   :  { %1379 = vst.msk [vmem:[#allocation15 + $0x4] sm:$0x3] %vm93_vm0, %v1376_v60  ;;  %2159 = vmatmul.mubr.msk.f32.vlgmr.msra.gmra.mrb[12].mxu1 %vm111_vm2, %v1376_v60 }
0x10d4   :  { %2275 = vmatpush3.bf16.msra.mxu1 %v2756_v5  ;;  %2180 = vmatprep.mubr.msk.f32.mxu1 %vm2626_vm1, %v2625_v1  ;;  %v1486_v5 = vld [vmem:[#allocation9 + $0x2] sm:$0x3] }
0x10d5   :  { %2276 = vmatprep.subr.bf16.mxu1 %v2624_v0 }
0x10d6   :  { %v1271_v61 = vpop.permute.xlu1 %1270 }
0x10d7   :  { %1274 = vst.msk [vmem:[#allocation14 + $0xa] sm:$0x3] %vm93_vm0, %v1271_v61  ;;  %2148 = vmatmul.mubr.msk.f32.vlgmr.msra.gmra.mrb[12].mxu0 %vm111_vm2, %v1271_v61 }
0x10d8   :  { %2269 = vmatpush3.bf16.msra.mxu0 %v2758_v9  ;;  %2278 = vmatpush3.bf16.msra.mxu1 %v2761_v12 }
0x10d9   :  { %2270 = vmatprep.subr.bf16.mxu0 %v2624_v0  ;;  %2169 = vmatprep.mubr.msk.f32.mxu0 %vm2626_vm1, %v2625_v1 }
0x10dc   :  { %2272 = vmatpush3.bf16.msra.mxu0 %v2765_v14 }
0x11a6   :  { %v1555_v62 = vpop.f32.mrb[12].mxu1 }
0x11a7   :  { %v1559_v63 = vadd.f32 %v1555_v62, %v1486_v5  ;;  %v2160_v2 = vpop.f32.mrb[13].mxu1 }
0x11a9   :  { %2392 = vtanh.f32 %v1559_v63  ;;  %v1922_v0 = vmul.f32 -1.442695, %v1559_v63 }
0x11aa   :  { %v1450_v4 = vpop.f32.mrb[12].mxu0 }
0x11ab   :  { %v1454_v6 = vadd.f32 %v1450_v4, %v1381_v3  ;;  %v2149_v7 = vpop.f32.mrb[13].mxu0 }
0x11ad   :  { %2394 = vtanh.f32 %v1454_v6  ;;  %v1920_v1 = vmul.f32 -1.442695, %v1454_v6 }
0x11ae   :  { %2396 = vpow2.f32 %v1922_v0 }
0x11af   :  { %2398 = vpow2.f32 %v1920_v1 }
0x11b3   :  { %v2393_v9 = vpop.eup %2392 }
0x11b4   :  { %1569 = vrot.lane.b32.xlu0 %v2393_v9, %s2617_s17 }
0x11b7   :  { %v2395_v12 = vpop.eup %2394 }
0x11b8   :  { %1464 = vrot.lane.b32.xlu1 %v2395_v12, %s2617_s17  ;;  %v2397_v14 = vpop.eup %2396 }
0x11b9   :  { %v1563_v8 = vadd.f32 1.0, %v2397_v14  ;;  %v2399_v10 = vpop.eup %2398 }
0x11ba   :  { %v1458_v11 = vadd.f32 1.0, %v2399_v10 }
0x11bb   :  { %2400 = vrcp.f32 %v1563_v8 }
0x11bc   :  { %2402 = vrcp.f32 %v1458_v11 }
0x11c5   :  { %v2401_v13 = vpop.eup %2400 }
0x11c6   :  { %v2403_v17 = vpop.eup %2402  ;;  %v1567_v20 = vmul.f32 %v2401_v13, %v1367_v50 }
0x11c7   :  { %v1462_v23 = vmul.f32 %v2403_v17, %v1262_v53 }
0x1226   :  { %v1570_v15 = vpop.permute.xlu0 %1569 }
0x1227   :  { %v1572_v16 = vmul.f32 %v2401_v13, %v1570_v15 }
0x1229   :  { %1574 = vrot.lane.b32.xlu0 %v1572_v16, %s2618_s18 }
0x122a   :  { %v1465_v18 = vpop.permute.xlu1 %1464 }
0x122b   :  { %v1467_v19 = vmul.f32 %v2403_v17, %v1465_v18 }
0x122d   :  { %1469 = vrot.lane.b32.xlu1 %v1467_v19, %s2618_s18 }
0x129b   :  { %v1575_v21 = vpop.permute.xlu0 %1574 }
0x129c   :  { %v1577_v22 = vadd.f32 %v1575_v21, %v1567_v20 }
0x129e   :  { %2404 = vtanh.f32 %v1577_v22 }
0x129f   :  { %v1470_v24 = vpop.permute.xlu1 %1469 }
0x12a0   :  { %v1472_v25 = vadd.f32 %v1470_v24, %v1462_v23 }
0x12a2   :  { %2406 = vtanh.f32 %v1472_v25 }
0x12a8   :  { %v2405_v26 = vpop.eup %2404 }
0x12a9   :  { %1580 = vrot.lane.b32.xlu0 %v2405_v26, %s2617_s17 }
0x12ac   :  { %v2407_v27 = vpop.eup %2406 }
0x12ad   :  { %1475 = vrot.lane.b32.xlu1 %v2407_v27, %s2617_s17 }
0x131b   :  { %v1581_v28 = vpop.permute.xlu0 %1580 }
0x131c   :  { %v1583_v29 = vmul.f32 %v2401_v13, %v1581_v28 }
0x131e   :  { %1585 = vrot.lane.b32.xlu0 %v1583_v29, %s2618_s18 }
0x131f   :  { %v1476_v30 = vpop.permute.xlu1 %1475 }
0x1320   :  { %v1478_v31 = vmul.f32 %v2403_v17, %v1476_v30 }
0x1322   :  { %1480 = vrot.lane.b32.xlu1 %v1478_v31, %s2618_s18 }
0x1390   :  { %v1586_v32 = vpop.permute.xlu0 %1585 }
0x1391   :  { %1589 = vst.msk [vmem:[#allocation15 + $0x2] sm:$0x3] %vm93_vm0, %v1586_v32  ;;  %2181 = vmatmul.mubr.msk.f32.vlgmr.msra.gmra.mrb[14].mxu1 %vm111_vm2, %v1586_v32 }
0x1394   :  { %v1481_v33 = vpop.permute.xlu1 %1480 }
0x1395   :  { %1484 = vst.msk [vmem:[#allocation14 + $0xc] sm:$0x3] %vm93_vm0, %v1481_v33  ;;  %2170 = vmatmul.mubr.msk.f32.vlgmr.msra.gmra.mrb[14].mxu0 %vm111_vm2, %v1481_v33 }
0x1464   :  { %v1764_v35 = vpop.f32.mrb[14].mxu1 }
0x1465   :  { %v1768_v36 = vadd.f32 %v1764_v35, %v1695_v34  ;;  %v2182_v37 = vpop.f32.mrb[15].mxu1 }
0x1467   :  { %2408 = vtanh.f32 %v1768_v36  ;;  %v1926_v44 = vmul.f32 -1.442695, %v1768_v36 }
0x1468   :  { %v1660_v39 = vpop.f32.mrb[14].mxu0 }
0x1469   :  { %v1664_v40 = vadd.f32 %v1660_v39, %v1591_v38  ;;  %v2171_v41 = vpop.f32.mrb[15].mxu0 }
0x146b   :  { %2410 = vtanh.f32 %v1664_v40  ;;  %v1924_v45 = vmul.f32 -1.442695, %v1664_v40 }
0x146c   :  { %2412 = vpow2.f32 %v1926_v44 }
0x146d   :  { %2414 = vpow2.f32 %v1924_v45 }
0x1471   :  { %v2409_v42 = vpop.eup %2408 }
0x1472   :  { %1778 = vrot.lane.b32.xlu0 %v2409_v42, %s2617_s17 }
0x1475   :  { %v2411_v43 = vpop.eup %2410 }
0x1476   :  { %1674 = vrot.lane.b32.xlu1 %v2411_v43, %s2617_s17  ;;  %v2413_v46 = vpop.eup %2412 }
0x1477   :  { %v1772_v47 = vadd.f32 1.0, %v2413_v46  ;;  %v2415_v48 = vpop.eup %2414 }
0x1478   :  { %v1668_v49 = vadd.f32 1.0, %v2415_v48 }
0x1479   :  { %2416 = vrcp.f32 %v1772_v47 }
0x147a   :  { %2418 = vrcp.f32 %v1668_v49 }
0x1483   :  { %v2417_v50 = vpop.eup %2416 }
0x1484   :  { %v2419_v53 = vpop.eup %2418  ;;  %v1776_v56 = vmul.f32 %v2417_v50, %v1577_v22 }
0x1485   :  { %v1672_v59 = vmul.f32 %v2419_v53, %v1472_v25 }
0x14e4   :  { %v1779_v51 = vpop.permute.xlu0 %1778 }
0x14e5   :  { %v1781_v52 = vmul.f32 %v2417_v50, %v1779_v51 }
0x14e7   :  { %1783 = vrot.lane.b32.xlu0 %v1781_v52, %s2618_s18 }
0x14e8   :  { %v1675_v54 = vpop.permute.xlu1 %1674 }
0x14e9   :  { %v1677_v55 = vmul.f32 %v2419_v53, %v1675_v54 }
0x14eb   :  { %1679 = vrot.lane.b32.xlu1 %v1677_v55, %s2618_s18 }
0x1559   :  { %v1784_v57 = vpop.permute.xlu0 %1783 }
0x155a   :  { %v1786_v58 = vadd.f32 %v1784_v57, %v1776_v56 }
0x155c   :  { %2420 = vtanh.f32 %v1786_v58 }
0x155d   :  { %v1680_v60 = vpop.permute.xlu1 %1679 }
0x155e   :  { %v1682_v61 = vadd.f32 %v1680_v60, %v1672_v59 }
0x1560   :  { %2422 = vtanh.f32 %v1682_v61 }
0x1566   :  { %v2421_v5 = vpop.eup %2420 }
0x1567   :  { %1789 = vrot.lane.b32.xlu0 %v2421_v5, %s2617_s17 }
0x156a   :  { %v2423_v62 = vpop.eup %2422 }
0x156b   :  { %1685 = vrot.lane.b32.xlu1 %v2423_v62, %s2617_s17  ;;  %s2630_s17 = smov [#allocation17]  }
0x156c   :  { %s1852_s1 = sshll.u32 %s2630_s17, 4  ;;  %s3008_s1 = int_to_ptr.vmem [resolvable:$true] %s1852_s1 }
0x15d9   :  { %v1790_v63 = vpop.permute.xlu0 %1789 }
0x15da   :  { %v1792_v2 = vmul.f32 %v2417_v50, %v1790_v63 }
0x15dc   :  { %1794 = vrot.lane.b32.xlu0 %v1792_v2, %s2618_s18 }
0x15dd   :  { %v1686_v3 = vpop.permute.xlu1 %1685 }
0x15de   :  { %v1688_v4 = vmul.f32 %v2419_v53, %v1686_v3 }
0x15e0   :  { %1800 = vrot.lane.b32.xlu0 %v1682_v61, %s2627_s3  ;;  %1690 = vrot.lane.b32.xlu1 %v1688_v4, %s2618_s18 }
0x15e4   :  { %1806 = vrot.lane.b32.xlu1 %v1786_v58, %s2627_s3 }
0x164e   :  { %v1795_v6 = vpop.permute.xlu0 %1794 }
0x164f   :  { %1797 = vst.msk [vmem:[#allocation15] sm:$0x3] %vm93_vm0, %v1795_v6  ;;  %1804 = vst.msk [vmem:[#allocation4] sm:$0x3] %vm93_vm0, %v1795_v6 }
0x1650   :  { %1815 = vst.msk [vmem:[#allocation17 + $0x2] sm:$0x3] %vm93_vm0, %v1795_v6 }
0x1651   :  { %2526 = shalt.err (!%p2523_p0)
}
0x1652   :  { %s2527_s23 = scalar_lea.hbm %s3079_s5, 256 }
0x1653   :  { %p2528_p1 = scmp.ne.s32.totalorder %s3079_s5, %s2527_s23  ;;  %p2531_p2 = scmp.lt.u32.totalorder %s2527_s23, %s3079_s5 }
0x1655   :  { %p2533_p3 = pnand %p2531_p2, %p2528_p1 }
0x1657   :  { %2536 = shalt.err (!%p2533_p3)
}
0x1658   :  { %1846 = dma.vmem_to_hbm [thread:$0]  %s1841_s14, 256, %s3079_s5, [#allocation16], %s2618_s18, %s2618_s18, %s2619_s19   ;;  %v1801_v7 = vpop.permute.xlu0 %1800  ;;  %v1691_v9 = vpop.permute.xlu1 %1690 }
0x1659   :  { %1803 = vst.msk [vmem:[#allocation3] sm:$0x3] %vm93_vm0, %v1801_v7  ;;  %1816 = vst.msk [vmem:[#allocation18] sm:$0x3] %vm93_vm0, %v1801_v7  ;;  %s2537_s28 = scalar_lea.vmem %s1825_s16, 256  ;;  %p2542_p5 = scmp.lt.s32.totalorder %s1825_s16, %s1825_s16 }
0x165a   :  { %1694 = vst.msk [vmem:[#allocation14 + $0xe] sm:$0x3] %vm93_vm0, %v1691_v9  ;;  %1798 = vst.msk [vmem:[#allocation2] sm:$0x3] %vm93_vm0, %v1691_v9  ;;  %p2538_p4 = scmp.ne.s32.totalorder %s1825_s16, %s2537_s28  ;;  %p2543_p6 = scmp.lt.s32.totalorder %s2537_s28, %s2537_s28 }
0x165b   :  { %1813 = vst.msk [vmem:[#allocation17] sm:$0x3] %vm93_vm0, %v1691_v9 }
0x165c   :  { %p2544_p7 = por %p2543_p6, %p2542_p5 }
0x165e   :  { %p2545_p8 = pnand %p2544_p7, %p2538_p4 }
0x1660   :  { %2548 = shalt.err (!%p2545_p8)
}
0x1661   :  { %s2549_s10 = scalar_lea.hbm %s3078_s4, 256 }
0x1662   :  { %p2550_p9 = scmp.ne.s32.totalorder %s3078_s4, %s2549_s10  ;;  %p2553_p10 = scmp.lt.u32.totalorder %s2549_s10, %s3078_s4 }
0x1664   :  { %p2555_p11 = pnand %p2553_p10, %p2550_p9 }
0x1666   :  { %2558 = shalt.err (!%p2555_p11)
}
0x1667   :  { %1830 = dma.vmem_to_hbm [thread:$0]  %s1825_s16, 256, %s3078_s4, [#allocation8], %s2618_s18, %s2618_s18, %s2619_s19  }
0x1668   :  { %s2559_s15 = scalar_lea.vmem %s3008_s1, 64  ;;  %p2564_p13 = scmp.lt.s32.totalorder %s3008_s1, %s3008_s1 }
0x1669   :  { %p2560_p12 = scmp.ne.s32.totalorder %s3008_s1, %s2559_s15  ;;  %p2565_p0 = scmp.lt.s32.totalorder %s2559_s15, %s2559_s15 }
0x166b   :  { %p2566_p1 = por %p2565_p0, %p2564_p13 }
0x166d   :  { %p2567_p2 = pnand %p2566_p1, %p2560_p12 }
0x166f   :  { %2570 = shalt.err (!%p2567_p2)
}
0x1670   :  { %s2571_s0 = scalar_lea.hbm %s3080_s6, 64 }
0x1671   :  { %p2572_p3 = scmp.ne.s32.totalorder %s3080_s6, %s2571_s0  ;;  %p2575_p4 = scmp.lt.u32.totalorder %s2571_s0, %s3080_s6 }
0x1673   :  { %p2577_p5 = pnand %p2575_p4, %p2572_p3 }
0x1675   :  { %2580 = shalt.err (!%p2577_p5)
}
0x1676   :  { %1858 = dma.vmem_to_hbm [thread:$0]  %s3008_s1, 64, %s3080_s6, [#allocation16], %s2618_s18, %s2618_s18, %s2619_s19   ;;  %v1807_v12 = vpop.permute.xlu1 %1806 }
0x1677   :  { %1809 = vst.msk [vmem:[#allocation5] sm:$0x3] %vm93_vm0, %v1807_v12  ;;  %1818 = vst.msk [vmem:[#allocation18 + $0x2] sm:$0x3] %vm93_vm0, %v1807_v12  ;;  %s2581_s25 = scalar_lea.vmem %s3015_s21, 64  ;;  %p2586_p7 = scmp.lt.s32.totalorder %s3015_s21, %s3015_s21 }
0x1678   :  { %p2582_p6 = scmp.ne.s32.totalorder %s3015_s21, %s2581_s25  ;;  %p2587_p8 = scmp.lt.s32.totalorder %s2581_s25, %s2581_s25 }
0x167a   :  { %p2588_p9 = por %p2587_p8, %p2586_p7 }
0x167c   :  { %p2589_p10 = pnand %p2588_p9, %p2582_p6 }
0x167e   :  { %2592 = shalt.err (!%p2589_p10)
}
0x167f   :  { %s2593_s8 = scalar_lea.hbm %s3081_s7, 64 }
0x1680   :  { %p2594_p11 = scmp.ne.s32.totalorder %s3081_s7, %s2593_s8  ;;  %p2597_p12 = scmp.lt.u32.totalorder %s2593_s8, %s3081_s7 }
0x1682   :  { %p2599_p13 = pnand %p2597_p12, %p2594_p11 }
0x1684   :  { %2602 = shalt.err (!%p2599_p13)
}
0x1685   :  { %1870 = dma.vmem_to_hbm [thread:$0]  %s3015_s21, 64, %s3081_s7, [#allocation19], %s2618_s18, %s2618_s18, %s2619_s19  }
0x1686   :  { %2609 = dma.done.wait [#allocation8], 256  }
0x1687   :  { %2610 = vsyncadd [#allocation8], 4294967040 }
0x1688   :  { %2611 = dma.done.wait [#allocation16], 320  }
0x1689   :  { %2612 = vsyncadd [#allocation16], 4294966976 }
0x168a   :  { %2613 = dma.done.wait [#allocation19], 64  }
0x168b   :  { %2614 = vsyncadd [#allocation19], 4294967232 }
0x168c   :  { %1883 = vsyncpa [#allocation7], 1 }
0x168d   :  { %1884 = vsyncpa [#allocation10], 1 }
0x168e   :  { %1885 = vsyncpa [#allocation13], 1 }
0x168f   :  { %1886 = vsyncpa [#allocation8], 1 }
0x1690   :  { %1887 = vsyncpa [#allocation16], 1 }
0x1691   :  { %1888 = vsyncpa [#allocation19], 1 }

</bundles_post_ra>
